<compile_context>
chip_gen: v5e
topology: v5e:2x2
jax: 0.10.0
libtpu: 0.0.40
codegen_flags: <defaults>
</compile_context>

<pallas_src>
import math

import jax
import jax.numpy as jnp
from jax.experimental import pallas as pl
from jax.experimental.pallas import tpu as pltpu

# ---------------------------- configuration ---------------------------------
B = 2                 # batch (number of windows)
WINDOW = 4            # window_size  -> N = WINDOW**2 tokens
N = WINDOW * WINDOW   # sequence length (16)
C = 32                # dim
NUM_HEADS = 4
HEAD_DIM = C // NUM_HEADS        # 8
MLP_RATIO = 4.0
HIDDEN = int(C * MLP_RATIO)      # 128
SCALE = HEAD_DIM ** (-0.5)
LN_EPS = 1e-5
INV_SQRT2 = 1.0 / math.sqrt(2.0)

SLAB_W = HIDDEN                  # lane width of the packed weight slab (=128)
VROW = 2 * C                     # first vector row inside the weight slab
assert HIDDEN == 128 and C <= SLAB_W

_CONTRACT_LAST = (((1,), (1,)), ((), ()))   # dot_general "trans_b" dims


# ------------------------------ kernel ---------------------------------------
def block_kernel(
    x_ref,        # (B*N, C)        folded activations
    noise_ref,    # (B*N, 1)        per-token attention noise
    wattn_ref,    # (4*C, C)        rows: [wq.T | wk.T | wv.T | wproj]
    wslab_ref,    # (2*C+8, 128)    wfc1, wfc2.T, gammas/betas/biases, strength
    relb_ref,     # (H*N, N)        relative position bias, head-major rows
    o_ref,        # (B*N, C)
):
    f32 = jnp.float32
    x = x_ref[...]
    noise = noise_ref[...]
    wattn = wattn_ref[...]
    wslab = wslab_ref[...]
    relb = relb_ref[...]                  # hoisted: loaded once, reused per window

    wfc1 = wslab[:C, :]                   # (C, HIDDEN)
    wfc2t = wslab[C:2 * C, :]             # (C, HIDDEN) == fc2 weight (out, in)
    g1 = wslab[VROW + 0:VROW + 1, :C]
    b1 = wslab[VROW + 1:VROW + 2, :C]
    bproj = wslab[VROW + 2:VROW + 3, :C]
    g2 = wslab[VROW + 3:VROW + 4, :C]
    b2 = wslab[VROW + 4:VROW + 5, :C]
    bfc1 = wslab[VROW + 5:VROW + 6, :]    # (1, HIDDEN)
    bfc2 = wslab[VROW + 6:VROW + 7, :C]
    nstr = wslab[VROW + 7:VROW + 8, 0:1]  # (1, 1) noise_strength_1

    def layernorm(v, g, b):
        mu = jnp.mean(v, axis=-1, keepdims=True)
        var = jnp.mean(jnp.square(v - mu), axis=-1, keepdims=True)
        return (v - mu) * jax.lax.rsqrt(var + LN_EPS) * g + b

    # ---- attention branch: LN1 + fused noise + windowed MHSA + proj ---------
    xn = layernorm(x, g1, b1)
    xa = xn + noise * nstr                # noise enters AFTER norm1 (as in PyTorch)

    # per-head q/k/v on all B*N rows at once; per-window scores via sublane slices
    v_heads = []
    s_tiles = [[] for _ in range(B)]      # s_tiles[window][head] -> (N, N)
    for h in range(NUM_HEADS):
        wq_h = wattn[h * HEAD_DIM:(h + 1) * HEAD_DIM, :]                 # (8, C)
        wk_h = wattn[C + h * HEAD_DIM:C + (h + 1) * HEAD_DIM, :]
        wv_h = wattn[2 * C + h * HEAD_DIM:2 * C + (h + 1) * HEAD_DIM, :]
        q_h = jax.lax.dot_general(xa, wq_h, _CONTRACT_LAST,
                                  preferred_element_type=f32)            # (B*N, 8), pre-scaled
        k_h = jax.lax.dot_general(xa, wk_h, _CONTRACT_LAST,
                                  preferred_element_type=f32)            # (B*N, 8)
        v_h = jax.lax.dot_general(xa, wv_h, _CONTRACT_LAST,
                                  preferred_element_type=f32)            # (B*N, 8)
        v_heads.append(v_h)
        for bb in range(B):
            qb = q_h[bb * N:(bb + 1) * N, :]
            kb = k_h[bb * N:(bb + 1) * N, :]
            s_tiles[bb].append(
                jax.lax.dot_general(qb, kb, _CONTRACT_LAST,
                                    preferred_element_type=f32))         # (N, N)

    # stack all B*H score tiles along sublanes -> (B*H*N, N), batch the softmax
    win_slabs = [jnp.concatenate(s_tiles[bb], axis=0) + relb for bb in range(B)]
    scores = jnp.concatenate(win_slabs, axis=0)                          # (128, 16)
    scores = scores - jnp.max(scores, axis=-1, keepdims=True)
    p = jnp.exp(scores)
    p = p / jnp.sum(p, axis=-1, keepdims=True)                           # exact reciprocal

    # per-head attn @ v and output projection (one (B*N,8)@(8,C) per head)
    acc = jnp.zeros((B * N, C), f32)
    for h in range(NUM_HEADS):
        v_h = v_heads[h]
        hv_parts = []
        for bb in range(B):
            p_bh = p[(bb * NUM_HEADS + h) * N:(bb * NUM_HEADS + h + 1) * N, :]
            v_bh = v_h[bb * N:(bb + 1) * N, :]
            hv_parts.append(jnp.dot(p_bh, v_bh, preferred_element_type=f32))
        hv = jnp.concatenate(hv_parts, axis=0)                           # (B*N, 8)
        wproj_h = wattn[3 * C + h * HEAD_DIM:3 * C + (h + 1) * HEAD_DIM, :]
        acc = acc + jnp.dot(hv, wproj_h, preferred_element_type=f32)     # (B*N, C)

    x1 = x + acc + bproj                                                 # residual 1

    # ---- MLP branch ----------------------------------------------------------
    xn2 = layernorm(x1, g2, b2)
    hdn = jnp.dot(xn2, wfc1, preferred_element_type=f32) + bfc1          # (B*N, HIDDEN)
    hdn = hdn * 0.5 * (1.0 + jax.lax.erf(hdn * INV_SQRT2))               # exact (erf) gelu
    mlp = jax.lax.dot_general(hdn, wfc2t, _CONTRACT_LAST,
                              preferred_element_type=f32) + bfc2         # (B*N, C)

    o_ref[...] = x1 + mlp                                                # residual 2


# ------------------------------ host-side packing ----------------------------
def pack_params(params, noise_strength):
    """One-time packing of all parameters into lane-dense kernel operands."""
    (g1, b1, wqkv, wproj, bproj, rel_bias, g2, b2,
     wfc1, bfc1, wfc2, bfc2) = params

    # attention weight slab: (4C, C) of 8-row per-head blocks in (out, in) rows
    wqkv_t = wqkv.T                                            # (3C, C)
    wqkv_t = jnp.concatenate([wqkv_t[:C] * SCALE, wqkv_t[C:]], axis=0)  # fold qk scale into q
    w_attn = jnp.concatenate([wqkv_t, wproj], axis=0)          # (4C, C) = (128, 32)

    def pad_row(v):
        return jnp.pad(v, (0, SLAB_W - v.shape[0]))

    strength_row = jnp.zeros((SLAB_W,), jnp.float32).at[0].set(noise_strength)
    vec_rows = jnp.stack(
        [pad_row(g1), pad_row(b1), pad_row(bproj), pad_row(g2), pad_row(b2),
         pad_row(bfc1), pad_row(bfc2), strength_row], axis=0)   # (8, 128)
    wslab = jnp.concatenate([wfc1, wfc2.T, vec_rows], axis=0)   # (2C+8, 128) = (72, 128)

    relb = rel_bias.reshape(NUM_HEADS * N, N)                   # (64, 16), head-major rows
    return w_attn, wslab, relb


# ------------------------------ wrapper --------------------------------------
@jax.jit
def block_forward(x, noise, w_attn, wslab, relb):
    x_flat = x.reshape(B * N, C)
    noise_flat = noise.reshape(B * N, 1)

    full = lambda shape: pl.BlockSpec(shape, lambda i, s=shape: (0,) * len(s))

    out = pl.pallas_call(
        block_kernel,
        out_shape=jax.ShapeDtypeStruct((B * N, C), jnp.float32),
        grid_spec=pltpu.PrefetchScalarGridSpec(
            num_scalar_prefetch=0,
            grid=(1,),                                  # single folded invocation
            in_specs=[
                full((B * N, C)),                       # x
                full((B * N, 1)),                       # noise
                full((4 * C, C)),                       # attention weight slab
                full((2 * C + 8, SLAB_W)),              # MLP / LN / bias slab
                full((NUM_HEADS * N, N)),               # relative position bias
            ],
            out_specs=full((B * N, C)),
        ),
        compiler_params=pltpu.CompilerParams(
            dimension_semantics=("arbitrary",)),
    )(x_flat, noise_flat, w_attn, wslab, relb)

    return out.reshape(B, N, C)


# ---------------------- deterministic parameter init -------------------------
def make_params(key):
    ks = jax.random.split(key, 8)

    def lin(k, fan_in, fan_out):
        # (in, out) layout so the math is x @ W
        return jax.random.normal(k, (fan_in, fan_out), jnp.float32) * 0.02

    g1 = jnp.ones((C,), jnp.float32)
    b1 = jnp.zeros((C,), jnp.float32)
    g2 = jnp.ones((C,), jnp.float32)
    b2 = jnp.zeros((C,), jnp.float32)

    wqkv = lin(ks[0], C, 3 * C)                 # qkv_bias=False
    wproj = lin(ks[1], C, C)
    bproj = jnp.zeros((C,), jnp.float32)
    wfc1 = lin(ks[2], C, HIDDEN)
    bfc1 = jnp.zeros((HIDDEN,), jnp.float32)
    wfc2 = lin(ks[3], HIDDEN, C)
    bfc2 = jnp.zeros((C,), jnp.float32)

    # relative position bias (trunc_normal(std=0.02) table, gathered by index)
    table = (jax.random.truncated_normal(
        ks[4], -2.0, 2.0, ((2 * WINDOW - 1) ** 2, NUM_HEADS), jnp.float32)
        * 0.02)
    coords_h = jnp.arange(WINDOW)
    coords_w = jnp.arange(WINDOW)
    coords = jnp.stack(jnp.meshgrid(coords_h, coords_w, indexing="ij"))  # (2,W,W)
    coords_flat = coords.reshape(2, -1)                                  # (2,N)
    rel = coords_flat[:, :, None] - coords_flat[:, None, :]              # (2,N,N)
    rel = rel.transpose(1, 2, 0)                                         # (N,N,2)
    rel = rel.at[:, :, 0].add(WINDOW - 1)
    rel = rel.at[:, :, 1].add(WINDOW - 1)
    rel = rel.at[:, :, 0].multiply(2 * WINDOW - 1)
    rel_index = rel.sum(-1)                                              # (N,N)
    rel_bias = table[rel_index.reshape(-1)].reshape(N, N, NUM_HEADS)
    rel_bias = rel_bias.transpose(2, 0, 1).astype(jnp.float32)           # (H,N,N)

    # attention noise strength (nn.Parameter(torch.zeros([])))
    noise_strength = jnp.zeros((), jnp.float32)

    return (g1, b1, wqkv, wproj, bproj, rel_bias, g2, b2,
            wfc1, bfc1, wfc2, bfc2), noise_strength


# ------------------------ pure-JAX reference (check) --------------------------
def block_reference(x, noise, noise_strength, params):
    (g1, b1, wqkv, wproj, bproj, rel_bias, g2, b2,
     wfc1, bfc1, wfc2, bfc2) = params

    def ln(v, g, b):
        mu = v.mean(-1, keepdims=True)
        var = ((v - mu) ** 2).mean(-1, keepdims=True)
        return (v - mu) / jnp.sqrt(var + LN_EPS) * g + b

    xn = ln(x, g1, b1)
    xa = xn + noise * noise_strength            # noise inside Attention.forward
    qkv = (xa @ wqkv).reshape(B, N, 3, NUM_HEADS, HEAD_DIM)
    qkv = qkv.transpose(2, 0, 3, 1, 4)
    q, k, v = qkv[0], qkv[1], qkv[2]
    att = jnp.einsum("bhnd,bhmd->bhnm", q, k) * SCALE + rel_bias[None]
    att = jax.nn.softmax(att, axis=-1)
    out = jnp.einsum("bhnm,bhmd->bhnd", att, v)
    out = out.transpose(0, 2, 1, 3).reshape(B, N, C)
    out = out @ wproj + bproj
    x = x + out
    xn2 = ln(x, g2, b2)
    h = xn2 @ wfc1 + bfc1
    h = h * 0.5 * (1.0 + jax.lax.erf(h * INV_SQRT2))
    return x + (h @ wfc2 + bfc2)


# ------------------------------- main -----------------------------------------
if __name__ == "__main__":
    key = jax.random.PRNGKey(0)
    k_x, k_p, k_noise = jax.random.split(key, 3)

    x = jax.random.normal(k_x, (B, N, C), jnp.float32)
    params, noise_strength = make_params(k_p)

    # per-forward attention noise (torch.randn in the PyTorch module); the
    # strength parameter is zero-initialized exactly as in the reference,
    # but the kernel computes the fused FMA so non-zero values also work.
    noise = jax.random.normal(k_noise, (B, N, 1), jnp.float32)

    w_attn, wslab, relb = pack_params(params, noise_strength)

    y = block_forward(x, noise, w_attn, wslab, relb)
    y = jax.block_until_ready(y)

    y_ref = block_reference(x, noise, noise_strength, params)
    assert jnp.allclose(y, y_ref, atol=1e-3, rtol=1e-3), "mismatch vs reference"

    print("KERNEL_OK")
</pallas_src>

<mosaic_0001>
module attributes {stable_mosaic.version = 11 : i64} {
  func.func @block_kernel(%arg0: i32, %arg1: memref<32x32xf32, #tpu.memory_space<vmem>>, %arg2: memref<32x1xf32, #tpu.memory_space<vmem>>, %arg3: memref<128x32xf32, #tpu.memory_space<vmem>>, %arg4: memref<72x128xf32, #tpu.memory_space<vmem>>, %arg5: memref<64x16xf32, #tpu.memory_space<vmem>>, %arg6: memref<32x32xf32, #tpu.memory_space<vmem>>) attributes {dimension_semantics = [#tpu.dimension_semantics<arbitrary>], iteration_bounds = array<i64: 1>, scalar_prefetch = 0 : i64, scratch_operands = 0 : i64, tpu.core_type = #tpu.core_type<tc>, window_params = [{pipeline_mode = #tpu.pipeline_mode<synchronous>, transform_indices = @transform_0, window_bounds = array<i64: 32, 32>}, {pipeline_mode = #tpu.pipeline_mode<synchronous>, transform_indices = @transform_1, window_bounds = array<i64: 32, 1>}, {pipeline_mode = #tpu.pipeline_mode<synchronous>, transform_indices = @transform_2, window_bounds = array<i64: 128, 32>}, {pipeline_mode = #tpu.pipeline_mode<synchronous>, transform_indices = @transform_3, window_bounds = array<i64: 72, 128>}, {pipeline_mode = #tpu.pipeline_mode<synchronous>, transform_indices = @transform_4, window_bounds = array<i64: 64, 16>}, {pipeline_mode = #tpu.pipeline_mode<synchronous>, transform_indices = @transform_5, window_bounds = array<i64: 32, 32>}]} {
    %c0 = arith.constant 0 : index
    %c0_0 = arith.constant 0 : index
    %0 = vector.load %arg1[%c0, %c0_0] : memref<32x32xf32, #tpu.memory_space<vmem>>, vector<32x32xf32>
    %c0_1 = arith.constant 0 : index
    %c0_2 = arith.constant 0 : index
    %1 = vector.load %arg2[%c0_1, %c0_2] : memref<32x1xf32, #tpu.memory_space<vmem>>, vector<32x1xf32>
    %c0_3 = arith.constant 0 : index
    %c0_4 = arith.constant 0 : index
    %2 = vector.load %arg3[%c0_3, %c0_4] : memref<128x32xf32, #tpu.memory_space<vmem>>, vector<128x32xf32>
    %c0_5 = arith.constant 0 : index
    %c0_6 = arith.constant 0 : index
    %3 = vector.load %arg4[%c0_5, %c0_6] : memref<72x128xf32, #tpu.memory_space<vmem>>, vector<72x128xf32>
    %c0_7 = arith.constant 0 : index
    %c0_8 = arith.constant 0 : index
    %4 = vector.load %arg5[%c0_7, %c0_8] : memref<64x16xf32, #tpu.memory_space<vmem>>, vector<64x16xf32>
    %5 = vector.extract_strided_slice %3 {offsets = [0, 0], sizes = [32, 128], strides = [1, 1]} : vector<72x128xf32> to vector<32x128xf32>
    %6 = vector.extract_strided_slice %3 {offsets = [32, 0], sizes = [32, 128], strides = [1, 1]} : vector<72x128xf32> to vector<32x128xf32>
    %7 = vector.extract_strided_slice %3 {offsets = [64, 0], sizes = [1, 32], strides = [1, 1]} : vector<72x128xf32> to vector<1x32xf32>
    %8 = vector.extract_strided_slice %3 {offsets = [65, 0], sizes = [1, 32], strides = [1, 1]} : vector<72x128xf32> to vector<1x32xf32>
    %9 = vector.extract_strided_slice %3 {offsets = [66, 0], sizes = [1, 32], strides = [1, 1]} : vector<72x128xf32> to vector<1x32xf32>
    %10 = vector.extract_strided_slice %3 {offsets = [67, 0], sizes = [1, 32], strides = [1, 1]} : vector<72x128xf32> to vector<1x32xf32>
    %11 = vector.extract_strided_slice %3 {offsets = [68, 0], sizes = [1, 32], strides = [1, 1]} : vector<72x128xf32> to vector<1x32xf32>
    %12 = vector.extract_strided_slice %3 {offsets = [69, 0], sizes = [1, 128], strides = [1, 1]} : vector<72x128xf32> to vector<1x128xf32>
    %13 = vector.extract_strided_slice %3 {offsets = [70, 0], sizes = [1, 32], strides = [1, 1]} : vector<72x128xf32> to vector<1x32xf32>
    %14 = vector.extract_strided_slice %3 {offsets = [71, 0], sizes = [1, 1], strides = [1, 1]} : vector<72x128xf32> to vector<1x1xf32>
    %cst = arith.constant dense<0.000000e+00> : vector<32xf32>
    %15 = vector.multi_reduction <add>, %0, %cst [1] : vector<32x32xf32> to vector<32xf32>
    %16 = vector.shape_cast %15 : vector<32xf32> to vector<32x1xf32>
    %cst_9 = arith.constant 3.200000e+01 : f32
    %17 = vector.broadcast %cst_9 : f32 to vector<32x1xf32>
    %18 = arith.divf %16, %17 : vector<32x1xf32>
    %19 = vector.broadcast %18 : vector<32x1xf32> to vector<32x32xf32>
    %20 = arith.subf %0, %19 : vector<32x32xf32>
    %21 = arith.mulf %20, %20 : vector<32x32xf32>
    %cst_10 = arith.constant dense<0.000000e+00> : vector<32xf32>
    %22 = vector.multi_reduction <add>, %21, %cst_10 [1] : vector<32x32xf32> to vector<32xf32>
    %23 = vector.shape_cast %22 : vector<32xf32> to vector<32x1xf32>
    %cst_11 = arith.constant 3.200000e+01 : f32
    %24 = vector.broadcast %cst_11 : f32 to vector<32x1xf32>
    %25 = arith.divf %23, %24 : vector<32x1xf32>
    %26 = vector.broadcast %18 : vector<32x1xf32> to vector<32x32xf32>
    %27 = arith.subf %0, %26 : vector<32x32xf32>
    %cst_12 = arith.constant 9.99999974E-6 : f32
    %28 = vector.broadcast %cst_12 : f32 to vector<32x1xf32>
    %29 = arith.addf %25, %28 : vector<32x1xf32>
    %30 = math.rsqrt %29 : vector<32x1xf32>
    %31 = vector.broadcast %30 : vector<32x1xf32> to vector<32x32xf32>
    %32 = arith.mulf %27, %31 : vector<32x32xf32>
    %33 = vector.broadcast %7 : vector<1x32xf32> to vector<32x32xf32>
    %34 = arith.mulf %32, %33 : vector<32x32xf32>
    %35 = vector.broadcast %8 : vector<1x32xf32> to vector<32x32xf32>
    %36 = arith.addf %34, %35 : vector<32x32xf32>
    %37 = vector.broadcast %14 : vector<1x1xf32> to vector<32x1xf32>
    %38 = arith.mulf %1, %37 : vector<32x1xf32>
    %39 = vector.broadcast %38 : vector<32x1xf32> to vector<32x32xf32>
    %40 = arith.addf %36, %39 : vector<32x32xf32>
    %41 = vector.extract_strided_slice %2 {offsets = [0, 0], sizes = [8, 32], strides = [1, 1]} : vector<128x32xf32> to vector<8x32xf32>
    %42 = vector.extract_strided_slice %2 {offsets = [32, 0], sizes = [8, 32], strides = [1, 1]} : vector<128x32xf32> to vector<8x32xf32>
    %43 = vector.extract_strided_slice %2 {offsets = [64, 0], sizes = [8, 32], strides = [1, 1]} : vector<128x32xf32> to vector<8x32xf32>
    %cst_13 = arith.constant dense<0.000000e+00> : vector<32x8xf32>
    %44 = tpu.matmul %40, %41, %cst_13 {dimension_numbers = #tpu.dot_dimension_numbers<[1], [1], [0], [0], [0, 0, 1, 0], [], []>} : vector<32x32xf32>, vector<8x32xf32>, vector<32x8xf32> -> vector<32x8xf32>
    %cst_14 = arith.constant dense<0.000000e+00> : vector<32x8xf32>
    %45 = tpu.matmul %40, %42, %cst_14 {dimension_numbers = #tpu.dot_dimension_numbers<[1], [1], [0], [0], [0, 0, 1, 0], [], []>} : vector<32x32xf32>, vector<8x32xf32>, vector<32x8xf32> -> vector<32x8xf32>
    %cst_15 = arith.constant dense<0.000000e+00> : vector<32x8xf32>
    %46 = tpu.matmul %40, %43, %cst_15 {dimension_numbers = #tpu.dot_dimension_numbers<[1], [1], [0], [0], [0, 0, 1, 0], [], []>} : vector<32x32xf32>, vector<8x32xf32>, vector<32x8xf32> -> vector<32x8xf32>
    %47 = vector.extract_strided_slice %44 {offsets = [0, 0], sizes = [16, 8], strides = [1, 1]} : vector<32x8xf32> to vector<16x8xf32>
    %48 = vector.extract_strided_slice %45 {offsets = [0, 0], sizes = [16, 8], strides = [1, 1]} : vector<32x8xf32> to vector<16x8xf32>
    %cst_16 = arith.constant dense<0.000000e+00> : vector<16x16xf32>
    %49 = tpu.matmul %47, %48, %cst_16 {dimension_numbers = #tpu.dot_dimension_numbers<[1], [1], [0], [0], [0, 0, 1, 0], [], []>} : vector<16x8xf32>, vector<16x8xf32>, vector<16x16xf32> -> vector<16x16xf32>
    %50 = vector.extract_strided_slice %44 {offsets = [16, 0], sizes = [16, 8], strides = [1, 1]} : vector<32x8xf32> to vector<16x8xf32>
    %51 = vector.extract_strided_slice %45 {offsets = [16, 0], sizes = [16, 8], strides = [1, 1]} : vector<32x8xf32> to vector<16x8xf32>
    %cst_17 = arith.constant dense<0.000000e+00> : vector<16x16xf32>
    %52 = tpu.matmul %50, %51, %cst_17 {dimension_numbers = #tpu.dot_dimension_numbers<[1], [1], [0], [0], [0, 0, 1, 0], [], []>} : vector<16x8xf32>, vector<16x8xf32>, vector<16x16xf32> -> vector<16x16xf32>
    %53 = vector.extract_strided_slice %2 {offsets = [8, 0], sizes = [8, 32], strides = [1, 1]} : vector<128x32xf32> to vector<8x32xf32>
    %54 = vector.extract_strided_slice %2 {offsets = [40, 0], sizes = [8, 32], strides = [1, 1]} : vector<128x32xf32> to vector<8x32xf32>
    %55 = vector.extract_strided_slice %2 {offsets = [72, 0], sizes = [8, 32], strides = [1, 1]} : vector<128x32xf32> to vector<8x32xf32>
    %cst_18 = arith.constant dense<0.000000e+00> : vector<32x8xf32>
    %56 = tpu.matmul %40, %53, %cst_18 {dimension_numbers = #tpu.dot_dimension_numbers<[1], [1], [0], [0], [0, 0, 1, 0], [], []>} : vector<32x32xf32>, vector<8x32xf32>, vector<32x8xf32> -> vector<32x8xf32>
    %cst_19 = arith.constant dense<0.000000e+00> : vector<32x8xf32>
    %57 = tpu.matmul %40, %54, %cst_19 {dimension_numbers = #tpu.dot_dimension_numbers<[1], [1], [0], [0], [0, 0, 1, 0], [], []>} : vector<32x32xf32>, vector<8x32xf32>, vector<32x8xf32> -> vector<32x8xf32>
    %cst_20 = arith.constant dense<0.000000e+00> : vector<32x8xf32>
    %58 = tpu.matmul %40, %55, %cst_20 {dimension_numbers = #tpu.dot_dimension_numbers<[1], [1], [0], [0], [0, 0, 1, 0], [], []>} : vector<32x32xf32>, vector<8x32xf32>, vector<32x8xf32> -> vector<32x8xf32>
    %59 = vector.extract_strided_slice %56 {offsets = [0, 0], sizes = [16, 8], strides = [1, 1]} : vector<32x8xf32> to vector<16x8xf32>
    %60 = vector.extract_strided_slice %57 {offsets = [0, 0], sizes = [16, 8], strides = [1, 1]} : vector<32x8xf32> to vector<16x8xf32>
    %cst_21 = arith.constant dense<0.000000e+00> : vector<16x16xf32>
    %61 = tpu.matmul %59, %60, %cst_21 {dimension_numbers = #tpu.dot_dimension_numbers<[1], [1], [0], [0], [0, 0, 1, 0], [], []>} : vector<16x8xf32>, vector<16x8xf32>, vector<16x16xf32> -> vector<16x16xf32>
    %62 = vector.extract_strided_slice %56 {offsets = [16, 0], sizes = [16, 8], strides = [1, 1]} : vector<32x8xf32> to vector<16x8xf32>
    %63 = vector.extract_strided_slice %57 {offsets = [16, 0], sizes = [16, 8], strides = [1, 1]} : vector<32x8xf32> to vector<16x8xf32>
    %cst_22 = arith.constant dense<0.000000e+00> : vector<16x16xf32>
    %64 = tpu.matmul %62, %63, %cst_22 {dimension_numbers = #tpu.dot_dimension_numbers<[1], [1], [0], [0], [0, 0, 1, 0], [], []>} : vector<16x8xf32>, vector<16x8xf32>, vector<16x16xf32> -> vector<16x16xf32>
    %65 = vector.extract_strided_slice %2 {offsets = [16, 0], sizes = [8, 32], strides = [1, 1]} : vector<128x32xf32> to vector<8x32xf32>
    %66 = vector.extract_strided_slice %2 {offsets = [48, 0], sizes = [8, 32], strides = [1, 1]} : vector<128x32xf32> to vector<8x32xf32>
    %67 = vector.extract_strided_slice %2 {offsets = [80, 0], sizes = [8, 32], strides = [1, 1]} : vector<128x32xf32> to vector<8x32xf32>
    %cst_23 = arith.constant dense<0.000000e+00> : vector<32x8xf32>
    %68 = tpu.matmul %40, %65, %cst_23 {dimension_numbers = #tpu.dot_dimension_numbers<[1], [1], [0], [0], [0, 0, 1, 0], [], []>} : vector<32x32xf32>, vector<8x32xf32>, vector<32x8xf32> -> vector<32x8xf32>
    %cst_24 = arith.constant dense<0.000000e+00> : vector<32x8xf32>
    %69 = tpu.matmul %40, %66, %cst_24 {dimension_numbers = #tpu.dot_dimension_numbers<[1], [1], [0], [0], [0, 0, 1, 0], [], []>} : vector<32x32xf32>, vector<8x32xf32>, vector<32x8xf32> -> vector<32x8xf32>
    %cst_25 = arith.constant dense<0.000000e+00> : vector<32x8xf32>
    %70 = tpu.matmul %40, %67, %cst_25 {dimension_numbers = #tpu.dot_dimension_numbers<[1], [1], [0], [0], [0, 0, 1, 0], [], []>} : vector<32x32xf32>, vector<8x32xf32>, vector<32x8xf32> -> vector<32x8xf32>
    %71 = vector.extract_strided_slice %68 {offsets = [0, 0], sizes = [16, 8], strides = [1, 1]} : vector<32x8xf32> to vector<16x8xf32>
    %72 = vector.extract_strided_slice %69 {offsets = [0, 0], sizes = [16, 8], strides = [1, 1]} : vector<32x8xf32> to vector<16x8xf32>
    %cst_26 = arith.constant dense<0.000000e+00> : vector<16x16xf32>
    %73 = tpu.matmul %71, %72, %cst_26 {dimension_numbers = #tpu.dot_dimension_numbers<[1], [1], [0], [0], [0, 0, 1, 0], [], []>} : vector<16x8xf32>, vector<16x8xf32>, vector<16x16xf32> -> vector<16x16xf32>
    %74 = vector.extract_strided_slice %68 {offsets = [16, 0], sizes = [16, 8], strides = [1, 1]} : vector<32x8xf32> to vector<16x8xf32>
    %75 = vector.extract_strided_slice %69 {offsets = [16, 0], sizes = [16, 8], strides = [1, 1]} : vector<32x8xf32> to vector<16x8xf32>
    %cst_27 = arith.constant dense<0.000000e+00> : vector<16x16xf32>
    %76 = tpu.matmul %74, %75, %cst_27 {dimension_numbers = #tpu.dot_dimension_numbers<[1], [1], [0], [0], [0, 0, 1, 0], [], []>} : vector<16x8xf32>, vector<16x8xf32>, vector<16x16xf32> -> vector<16x16xf32>
    %77 = vector.extract_strided_slice %2 {offsets = [24, 0], sizes = [8, 32], strides = [1, 1]} : vector<128x32xf32> to vector<8x32xf32>
    %78 = vector.extract_strided_slice %2 {offsets = [56, 0], sizes = [8, 32], strides = [1, 1]} : vector<128x32xf32> to vector<8x32xf32>
    %79 = vector.extract_strided_slice %2 {offsets = [88, 0], sizes = [8, 32], strides = [1, 1]} : vector<128x32xf32> to vector<8x32xf32>
    %cst_28 = arith.constant dense<0.000000e+00> : vector<32x8xf32>
    %80 = tpu.matmul %40, %77, %cst_28 {dimension_numbers = #tpu.dot_dimension_numbers<[1], [1], [0], [0], [0, 0, 1, 0], [], []>} : vector<32x32xf32>, vector<8x32xf32>, vector<32x8xf32> -> vector<32x8xf32>
    %cst_29 = arith.constant dense<0.000000e+00> : vector<32x8xf32>
    %81 = tpu.matmul %40, %78, %cst_29 {dimension_numbers = #tpu.dot_dimension_numbers<[1], [1], [0], [0], [0, 0, 1, 0], [], []>} : vector<32x32xf32>, vector<8x32xf32>, vector<32x8xf32> -> vector<32x8xf32>
    %cst_30 = arith.constant dense<0.000000e+00> : vector<32x8xf32>
    %82 = tpu.matmul %40, %79, %cst_30 {dimension_numbers = #tpu.dot_dimension_numbers<[1], [1], [0], [0], [0, 0, 1, 0], [], []>} : vector<32x32xf32>, vector<8x32xf32>, vector<32x8xf32> -> vector<32x8xf32>
    %83 = vector.extract_strided_slice %80 {offsets = [0, 0], sizes = [16, 8], strides = [1, 1]} : vector<32x8xf32> to vector<16x8xf32>
    %84 = vector.extract_strided_slice %81 {offsets = [0, 0], sizes = [16, 8], strides = [1, 1]} : vector<32x8xf32> to vector<16x8xf32>
    %cst_31 = arith.constant dense<0.000000e+00> : vector<16x16xf32>
    %85 = tpu.matmul %83, %84, %cst_31 {dimension_numbers = #tpu.dot_dimension_numbers<[1], [1], [0], [0], [0, 0, 1, 0], [], []>} : vector<16x8xf32>, vector<16x8xf32>, vector<16x16xf32> -> vector<16x16xf32>
    %86 = vector.extract_strided_slice %80 {offsets = [16, 0], sizes = [16, 8], strides = [1, 1]} : vector<32x8xf32> to vector<16x8xf32>
    %87 = vector.extract_strided_slice %81 {offsets = [16, 0], sizes = [16, 8], strides = [1, 1]} : vector<32x8xf32> to vector<16x8xf32>
    %cst_32 = arith.constant dense<0.000000e+00> : vector<16x16xf32>
    %88 = tpu.matmul %86, %87, %cst_32 {dimension_numbers = #tpu.dot_dimension_numbers<[1], [1], [0], [0], [0, 0, 1, 0], [], []>} : vector<16x8xf32>, vector<16x8xf32>, vector<16x16xf32> -> vector<16x16xf32>
    %89 = tpu.concatenate %49, %61, %73, %85 in 0 : vector<16x16xf32>, vector<16x16xf32>, vector<16x16xf32>, vector<16x16xf32> -> vector<64x16xf32>
    %90 = arith.addf %89, %4 : vector<64x16xf32>
    %91 = tpu.concatenate %52, %64, %76, %88 in 0 : vector<16x16xf32>, vector<16x16xf32>, vector<16x16xf32>, vector<16x16xf32> -> vector<64x16xf32>
    %92 = arith.addf %91, %4 : vector<64x16xf32>
    %93 = tpu.concatenate %90, %92 in 0 : vector<64x16xf32>, vector<64x16xf32> -> vector<128x16xf32>
    %cst_33 = arith.constant dense<0xFF800000> : vector<128xf32>
    %94 = vector.multi_reduction <maximumf>, %93, %cst_33 [1] : vector<128x16xf32> to vector<128xf32>
    %95 = vector.shape_cast %94 : vector<128xf32> to vector<128x1xf32>
    %96 = vector.broadcast %95 : vector<128x1xf32> to vector<128x16xf32>
    %97 = arith.subf %93, %96 : vector<128x16xf32>
    %98 = math.exp %97 : vector<128x16xf32>
    %cst_34 = arith.constant dense<0.000000e+00> : vector<128xf32>
    %99 = vector.multi_reduction <add>, %98, %cst_34 [1] : vector<128x16xf32> to vector<128xf32>
    %100 = vector.shape_cast %99 : vector<128xf32> to vector<128x1xf32>
    %101 = vector.broadcast %100 : vector<128x1xf32> to vector<128x16xf32>
    %102 = arith.divf %98, %101 : vector<128x16xf32>
    %cst_35 = arith.constant 0.000000e+00 : f32
    %103 = vector.broadcast %cst_35 : f32 to vector<32x32xf32>
    %104 = vector.extract_strided_slice %102 {offsets = [0, 0], sizes = [16, 16], strides = [1, 1]} : vector<128x16xf32> to vector<16x16xf32>
    %105 = vector.extract_strided_slice %46 {offsets = [0, 0], sizes = [16, 8], strides = [1, 1]} : vector<32x8xf32> to vector<16x8xf32>
    %cst_36 = arith.constant dense<0.000000e+00> : vector<16x8xf32>
    %106 = tpu.matmul %104, %105, %cst_36 {dimension_numbers = #tpu.dot_dimension_numbers<[1], [0], [0], [1], [0, 0, 1, 1], [], []>} : vector<16x16xf32>, vector<16x8xf32>, vector<16x8xf32> -> vector<16x8xf32>
    %107 = vector.extract_strided_slice %102 {offsets = [64, 0], sizes = [16, 16], strides = [1, 1]} : vector<128x16xf32> to vector<16x16xf32>
    %108 = vector.extract_strided_slice %46 {offsets = [16, 0], sizes = [16, 8], strides = [1, 1]} : vector<32x8xf32> to vector<16x8xf32>
    %cst_37 = arith.constant dense<0.000000e+00> : vector<16x8xf32>
    %109 = tpu.matmul %107, %108, %cst_37 {dimension_numbers = #tpu.dot_dimension_numbers<[1], [0], [0], [1], [0, 0, 1, 1], [], []>} : vector<16x16xf32>, vector<16x8xf32>, vector<16x8xf32> -> vector<16x8xf32>
    %110 = tpu.concatenate %106, %109 in 0 : vector<16x8xf32>, vector<16x8xf32> -> vector<32x8xf32>
    %111 = vector.extract_strided_slice %2 {offsets = [96, 0], sizes = [8, 32], strides = [1, 1]} : vector<128x32xf32> to vector<8x32xf32>
    %cst_38 = arith.constant dense<0.000000e+00> : vector<32x32xf32>
    %112 = tpu.matmul %110, %111, %cst_38 {dimension_numbers = #tpu.dot_dimension_numbers<[1], [0], [0], [1], [0, 0, 1, 1], [], []>} : vector<32x8xf32>, vector<8x32xf32>, vector<32x32xf32> -> vector<32x32xf32>
    %113 = arith.addf %103, %112 : vector<32x32xf32>
    %114 = vector.extract_strided_slice %102 {offsets = [16, 0], sizes = [16, 16], strides = [1, 1]} : vector<128x16xf32> to vector<16x16xf32>
    %115 = vector.extract_strided_slice %58 {offsets = [0, 0], sizes = [16, 8], strides = [1, 1]} : vector<32x8xf32> to vector<16x8xf32>
    %cst_39 = arith.constant dense<0.000000e+00> : vector<16x8xf32>
    %116 = tpu.matmul %114, %115, %cst_39 {dimension_numbers = #tpu.dot_dimension_numbers<[1], [0], [0], [1], [0, 0, 1, 1], [], []>} : vector<16x16xf32>, vector<16x8xf32>, vector<16x8xf32> -> vector<16x8xf32>
    %117 = vector.extract_strided_slice %102 {offsets = [80, 0], sizes = [16, 16], strides = [1, 1]} : vector<128x16xf32> to vector<16x16xf32>
    %118 = vector.extract_strided_slice %58 {offsets = [16, 0], sizes = [16, 8], strides = [1, 1]} : vector<32x8xf32> to vector<16x8xf32>
    %cst_40 = arith.constant dense<0.000000e+00> : vector<16x8xf32>
    %119 = tpu.matmul %117, %118, %cst_40 {dimension_numbers = #tpu.dot_dimension_numbers<[1], [0], [0], [1], [0, 0, 1, 1], [], []>} : vector<16x16xf32>, vector<16x8xf32>, vector<16x8xf32> -> vector<16x8xf32>
    %120 = tpu.concatenate %116, %119 in 0 : vector<16x8xf32>, vector<16x8xf32> -> vector<32x8xf32>
    %121 = vector.extract_strided_slice %2 {offsets = [104, 0], sizes = [8, 32], strides = [1, 1]} : vector<128x32xf32> to vector<8x32xf32>
    %cst_41 = arith.constant dense<0.000000e+00> : vector<32x32xf32>
    %122 = tpu.matmul %120, %121, %cst_41 {dimension_numbers = #tpu.dot_dimension_numbers<[1], [0], [0], [1], [0, 0, 1, 1], [], []>} : vector<32x8xf32>, vector<8x32xf32>, vector<32x32xf32> -> vector<32x32xf32>
    %123 = arith.addf %113, %122 : vector<32x32xf32>
    %124 = vector.extract_strided_slice %102 {offsets = [32, 0], sizes = [16, 16], strides = [1, 1]} : vector<128x16xf32> to vector<16x16xf32>
    %125 = vector.extract_strided_slice %70 {offsets = [0, 0], sizes = [16, 8], strides = [1, 1]} : vector<32x8xf32> to vector<16x8xf32>
    %cst_42 = arith.constant dense<0.000000e+00> : vector<16x8xf32>
    %126 = tpu.matmul %124, %125, %cst_42 {dimension_numbers = #tpu.dot_dimension_numbers<[1], [0], [0], [1], [0, 0, 1, 1], [], []>} : vector<16x16xf32>, vector<16x8xf32>, vector<16x8xf32> -> vector<16x8xf32>
    %127 = vector.extract_strided_slice %102 {offsets = [96, 0], sizes = [16, 16], strides = [1, 1]} : vector<128x16xf32> to vector<16x16xf32>
    %128 = vector.extract_strided_slice %70 {offsets = [16, 0], sizes = [16, 8], strides = [1, 1]} : vector<32x8xf32> to vector<16x8xf32>
    %cst_43 = arith.constant dense<0.000000e+00> : vector<16x8xf32>
    %129 = tpu.matmul %127, %128, %cst_43 {dimension_numbers = #tpu.dot_dimension_numbers<[1], [0], [0], [1], [0, 0, 1, 1], [], []>} : vector<16x16xf32>, vector<16x8xf32>, vector<16x8xf32> -> vector<16x8xf32>
    %130 = tpu.concatenate %126, %129 in 0 : vector<16x8xf32>, vector<16x8xf32> -> vector<32x8xf32>
    %131 = vector.extract_strided_slice %2 {offsets = [112, 0], sizes = [8, 32], strides = [1, 1]} : vector<128x32xf32> to vector<8x32xf32>
    %cst_44 = arith.constant dense<0.000000e+00> : vector<32x32xf32>
    %132 = tpu.matmul %130, %131, %cst_44 {dimension_numbers = #tpu.dot_dimension_numbers<[1], [0], [0], [1], [0, 0, 1, 1], [], []>} : vector<32x8xf32>, vector<8x32xf32>, vector<32x32xf32> -> vector<32x32xf32>
    %133 = arith.addf %123, %132 : vector<32x32xf32>
    %134 = vector.extract_strided_slice %102 {offsets = [48, 0], sizes = [16, 16], strides = [1, 1]} : vector<128x16xf32> to vector<16x16xf32>
    %135 = vector.extract_strided_slice %82 {offsets = [0, 0], sizes = [16, 8], strides = [1, 1]} : vector<32x8xf32> to vector<16x8xf32>
    %cst_45 = arith.constant dense<0.000000e+00> : vector<16x8xf32>
    %136 = tpu.matmul %134, %135, %cst_45 {dimension_numbers = #tpu.dot_dimension_numbers<[1], [0], [0], [1], [0, 0, 1, 1], [], []>} : vector<16x16xf32>, vector<16x8xf32>, vector<16x8xf32> -> vector<16x8xf32>
    %137 = vector.extract_strided_slice %102 {offsets = [112, 0], sizes = [16, 16], strides = [1, 1]} : vector<128x16xf32> to vector<16x16xf32>
    %138 = vector.extract_strided_slice %82 {offsets = [16, 0], sizes = [16, 8], strides = [1, 1]} : vector<32x8xf32> to vector<16x8xf32>
    %cst_46 = arith.constant dense<0.000000e+00> : vector<16x8xf32>
    %139 = tpu.matmul %137, %138, %cst_46 {dimension_numbers = #tpu.dot_dimension_numbers<[1], [0], [0], [1], [0, 0, 1, 1], [], []>} : vector<16x16xf32>, vector<16x8xf32>, vector<16x8xf32> -> vector<16x8xf32>
    %140 = tpu.concatenate %136, %139 in 0 : vector<16x8xf32>, vector<16x8xf32> -> vector<32x8xf32>
    %141 = vector.extract_strided_slice %2 {offsets = [120, 0], sizes = [8, 32], strides = [1, 1]} : vector<128x32xf32> to vector<8x32xf32>
    %cst_47 = arith.constant dense<0.000000e+00> : vector<32x32xf32>
    %142 = tpu.matmul %140, %141, %cst_47 {dimension_numbers = #tpu.dot_dimension_numbers<[1], [0], [0], [1], [0, 0, 1, 1], [], []>} : vector<32x8xf32>, vector<8x32xf32>, vector<32x32xf32> -> vector<32x32xf32>
    %143 = arith.addf %133, %142 : vector<32x32xf32>
    %144 = arith.addf %0, %143 : vector<32x32xf32>
    %145 = vector.broadcast %9 : vector<1x32xf32> to vector<32x32xf32>
    %146 = arith.addf %144, %145 : vector<32x32xf32>
    %cst_48 = arith.constant dense<0.000000e+00> : vector<32xf32>
    %147 = vector.multi_reduction <add>, %146, %cst_48 [1] : vector<32x32xf32> to vector<32xf32>
    %148 = vector.shape_cast %147 : vector<32xf32> to vector<32x1xf32>
    %cst_49 = arith.constant 3.200000e+01 : f32
    %149 = vector.broadcast %cst_49 : f32 to vector<32x1xf32>
    %150 = arith.divf %148, %149 : vector<32x1xf32>
    %151 = vector.broadcast %150 : vector<32x1xf32> to vector<32x32xf32>
    %152 = arith.subf %146, %151 : vector<32x32xf32>
    %153 = arith.mulf %152, %152 : vector<32x32xf32>
    %cst_50 = arith.constant dense<0.000000e+00> : vector<32xf32>
    %154 = vector.multi_reduction <add>, %153, %cst_50 [1] : vector<32x32xf32> to vector<32xf32>
    %155 = vector.shape_cast %154 : vector<32xf32> to vector<32x1xf32>
    %cst_51 = arith.constant 3.200000e+01 : f32
    %156 = vector.broadcast %cst_51 : f32 to vector<32x1xf32>
    %157 = arith.divf %155, %156 : vector<32x1xf32>
    %158 = vector.broadcast %150 : vector<32x1xf32> to vector<32x32xf32>
    %159 = arith.subf %146, %158 : vector<32x32xf32>
    %cst_52 = arith.constant 9.99999974E-6 : f32
    %160 = vector.broadcast %cst_52 : f32 to vector<32x1xf32>
    %161 = arith.addf %157, %160 : vector<32x1xf32>
    %162 = math.rsqrt %161 : vector<32x1xf32>
    %163 = vector.broadcast %162 : vector<32x1xf32> to vector<32x32xf32>
    %164 = arith.mulf %159, %163 : vector<32x32xf32>
    %165 = vector.broadcast %10 : vector<1x32xf32> to vector<32x32xf32>
    %166 = arith.mulf %164, %165 : vector<32x32xf32>
    %167 = vector.broadcast %11 : vector<1x32xf32> to vector<32x32xf32>
    %168 = arith.addf %166, %167 : vector<32x32xf32>
    %cst_53 = arith.constant dense<0.000000e+00> : vector<32x128xf32>
    %169 = tpu.matmul %168, %5, %cst_53 {dimension_numbers = #tpu.dot_dimension_numbers<[1], [0], [0], [1], [0, 0, 1, 1], [], []>} : vector<32x32xf32>, vector<32x128xf32>, vector<32x128xf32> -> vector<32x128xf32>
    %170 = vector.broadcast %12 : vector<1x128xf32> to vector<32x128xf32>
    %171 = arith.addf %169, %170 : vector<32x128xf32>
    %cst_54 = arith.constant 5.000000e-01 : f32
    %172 = vector.broadcast %cst_54 : f32 to vector<32x128xf32>
    %173 = arith.mulf %171, %172 : vector<32x128xf32>
    %cst_55 = arith.constant 0.707106769 : f32
    %174 = vector.broadcast %cst_55 : f32 to vector<32x128xf32>
    %175 = arith.mulf %171, %174 : vector<32x128xf32>
    %176 = math.erf %175 : vector<32x128xf32>
    %cst_56 = arith.constant 1.000000e+00 : f32
    %177 = vector.broadcast %cst_56 : f32 to vector<32x128xf32>
    %178 = arith.addf %177, %176 : vector<32x128xf32>
    %179 = arith.mulf %173, %178 : vector<32x128xf32>
    %cst_57 = arith.constant dense<0.000000e+00> : vector<32x32xf32>
    %180 = tpu.matmul %179, %6, %cst_57 {dimension_numbers = #tpu.dot_dimension_numbers<[1], [1], [0], [0], [0, 0, 1, 0], [], []>} : vector<32x128xf32>, vector<32x128xf32>, vector<32x32xf32> -> vector<32x32xf32>
    %181 = vector.broadcast %13 : vector<1x32xf32> to vector<32x32xf32>
    %182 = arith.addf %180, %181 : vector<32x32xf32>
    %183 = arith.addf %146, %182 : vector<32x32xf32>
    %c0_58 = arith.constant 0 : index
    %c0_59 = arith.constant 0 : index
    %184 = vector.load %arg6[%c0_58, %c0_59] : memref<32x32xf32, #tpu.memory_space<vmem>>, vector<32x32xf32>
    tpu.vector_store %arg6[%c0_58, %c0_59], %183 {strides = array<i32>} : memref<32x32xf32, #tpu.memory_space<vmem>>, vector<32x32xf32>,
    return
  }
  func.func @transform_0(%arg0: i32) -> (i32, i32) {
    %c0_i32 = arith.constant 0 : i32
    %c0_i32_0 = arith.constant 0 : i32
    %c0_i32_1 = arith.constant 0 : i32
    return %c0_i32, %c0_i32_0 : i32, i32
  }
  func.func @transform_1(%arg0: i32) -> (i32, i32) {
    %c0_i32 = arith.constant 0 : i32
    %c0_i32_0 = arith.constant 0 : i32
    %c0_i32_1 = arith.constant 0 : i32
    return %c0_i32, %c0_i32_0 : i32, i32
  }
  func.func @transform_2(%arg0: i32) -> (i32, i32) {
    %c0_i32 = arith.constant 0 : i32
    %c0_i32_0 = arith.constant 0 : i32
    %c0_i32_1 = arith.constant 0 : i32
    return %c0_i32, %c0_i32_0 : i32, i32
  }
  func.func @transform_3(%arg0: i32) -> (i32, i32) {
    %c0_i32 = arith.constant 0 : i32
    %c0_i32_0 = arith.constant 0 : i32
    %c0_i32_1 = arith.constant 0 : i32
    return %c0_i32, %c0_i32_0 : i32, i32
  }
  func.func @transform_4(%arg0: i32) -> (i32, i32) {
    %c0_i32 = arith.constant 0 : i32
    %c0_i32_0 = arith.constant 0 : i32
    %c0_i32_1 = arith.constant 0 : i32
    return %c0_i32, %c0_i32_0 : i32, i32
  }
  func.func @transform_5(%arg0: i32) -> (i32, i32) {
    %c0_i32 = arith.constant 0 : i32
    %c0_i32_0 = arith.constant 0 : i32
    %c0_i32_1 = arith.constant 0 : i32
    return %c0_i32, %c0_i32_0 : i32, i32
  }
}

</mosaic_0001>

<bundles_post_ra>
// kernel: block_forward.1
= control target key start
LH: loop header
LB: loop body
LE: loop exit
PB: predicated region body
PF: predicated region fallthrough
CT: control target
= control target key end

     0   :  { %vm62_vm0 = vcmask 261120   ;;  %s3123_s0 = inlined_call_operand.vmem [shape: f32[32,32], index: 0, kind: input, shape index: {}]   ;;  %s3124_s1 = inlined_call_operand.vmem [shape: f32[32,1], index: 1, kind: input, shape index: {}]   ;;  %s3125_s2 = inlined_call_operand.vmem [shape: f32[128,32], index: 2, kind: input, shape index: {}]   ;;  %s3126_s3 = inlined_call_operand.vmem [shape: f32[72,128], index: 3, kind: input, shape index: {}]   ;;  %s3127_s4 = inlined_call_operand.vmem [shape: f32[64,16], index: 4, kind: input, shape index: {}]   ;;  %s3128_s5 = inlined_call_operand.hbm [shape: f32[32,32], index: 5, kind: output, shape index: {}]  }
   0x1   :  { %v23_v0 = vld [vmem:[%s3123_s0 + $0x10] sm:$0xff]  ;;  %v21_v1 = vld [vmem:[%s3123_s0] sm:$0xff] }
   0x2   :  { %v69_v2 = vsel %vm62_vm0, %v23_v0, 0.0  ;;  %v63_v3 = vsel %vm62_vm0, %v21_v1, 0.0 }
   0x3   :  { %10 = vsyncpa [#allocation3], 0  ;;  %70 = vadd.xlane.f32.xlu1 %v69_v2  ;;  %64 = vadd.xlane.f32.xlu0 %v63_v3  ;;  %v24_v4 = vld [vmem:[%s3123_s0 + $0x18] sm:$0xff]  ;;  %v22_v5 = vld [vmem:[%s3123_s0 + $0x8] sm:$0xff]  ;;  %v2321_v8 = vmov 32.0   ;;  %v2322_v11 = vmov 0  }
   0x4   :  { %v72_v6 = vsel %vm62_vm0, %v24_v4, 0.0  ;;  %v66_v7 = vsel %vm62_vm0, %v22_v5, 0.0  ;;  %2200 = vrcp.f32 %v2321_v8  ;;  %2199 = vset.pattern.permute.xlu1 %v2322_v11  ;;  %2198 = vset.pattern.permute.xlu0 %v2322_v11  ;;  %v53_v36 = vld [vmem:[%s3126_s3 + $0x40] sm:$0xff]  ;;  %v26_v37 = vld [vmem:[%s3124_s1 + $0x8] sm:$0xff]  ;;  %v27_v41 = vld [vmem:[%s3124_s1 + $0x10] sm:$0xff]  ;;  %vm305_vm14 = vcmask 64512  }
   0x5   :  { %2197 = vset.pattern.permute.xlu2 %v2322_v11  ;;  %v168_v38 = vperm.slane %v53_v36, 7  ;;  %v25_v40 = vld [vmem:[%s3124_s1] sm:$0xff]  ;;  %v28_v44 = vld [vmem:[%s3124_s1 + $0x18] sm:$0xff]  ;;  %v34_v59 = vld [vmem:[%s3125_s2 + $0x28] sm:$0xff]  ;;  %vm890_vm15 = vcmask 130048   ;;  %s2324_s6 = smov 128  }
   0x6   :  { %v29_v46 = vld [vmem:[%s3125_s2] sm:$0xff]  ;;  %s2325_s7 = smov 8  }
   0x7   :  { %v170_v39 = vmul.f32 %v168_v38, %v26_v37  ;;  %v169_v42 = vmul.f32 %v168_v38, %v25_v40  ;;  %v171_v43 = vmul.f32 %v168_v38, %v27_v41  ;;  %v172_v45 = vmul.f32 %v168_v38, %v28_v44  ;;  %v33_v47 = vld [vmem:[%s3125_s2 + $0x20] sm:$0xff]  ;;  %2060 = vmatpush.xpose.msk.msra.mxu0 %vm62_vm0, %v29_v46 }
   0x8   :  { %v37_v48 = vld [vmem:[%s3125_s2 + $0x40] sm:$0xff]  ;;  %2065 = vmatpush.xpose.msk.msra.mxu1 %vm62_vm0, %v33_v47 }
   0x9   :  { %2070 = vmatpush.xpose.msk.msra.mxu2 %vm62_vm0, %v37_v48 }
   0xa   :  { %v2201_v9 = vpop.eup %2200 }
   0xb   :  { %73 = vadd.xlane.f32.xlu1 %v72_v6  ;;  %67 = vadd.xlane.f32.xlu0 %v66_v7  ;;  %v76_v10 = vmul.f32 32.0, %v2201_v9  ;;  %vm80_vm1 = vweird.f32 %v2201_v9 }
   0xc   :  { %2088 = vmatpush.xpose.msk.msrb.mxu1 %vm62_vm0, %v34_v59 }
   0xd   :  { %v77_v12 = vsub.f32 1.0, %v76_v10 }
   0xf   :  { %v78_v13 = vmul.f32 %v2201_v9, %v77_v12  ;;  %v158_v12 = vperm.slane %v53_v36, 0 }
  0x11   :  { %v79_v14 = vadd.f32 %v2201_v9, %v78_v13 }
  0x13   :  { %v2372_v15 = vsel %vm80_vm1, %v2201_v9, %v79_v14 }
  0x76   :  { %v71_v16 = vpop.xlane.xlu1 %70  ;;  %v65_v17 = vpop.xlane.xlu0 %64 }
  0x77   :  { %v84_v18 = vmul.f32 %v2372_v15, %v71_v16  ;;  %v82_v19 = vmul.f32 %v2372_v15, %v65_v17 }
  0x79   :  { %v2376_v20 = vsub.f32 %v23_v0, %v84_v18  ;;  %v2378_v21 = vsub.f32 %v21_v1, %v82_v19  ;;  %v163_v18 = vperm.slane %v53_v36, 1 }
  0x7b   :  { %v92_v22 = vmul.f32 %v2376_v20, %v2376_v20  ;;  %v90_v23 = vmul.f32 %v2378_v21, %v2378_v21 }
  0x7d   :  { %v100_v24 = vsel %vm62_vm0, %v92_v22, 0.0  ;;  %v94_v25 = vsel %vm62_vm0, %v90_v23, 0.0 }
  0x7e   :  { %v74_v26 = vpop.xlane.xlu1 %73  ;;  %101 = vadd.xlane.f32.xlu0 %v100_v24  ;;  %95 = vadd.xlane.f32.xlu2 %v94_v25  ;;  %v68_v27 = vpop.xlane.xlu0 %67  ;;  %v30_v24 = vld [vmem:[%s3125_s2 + $0x8] sm:$0xff] }
  0x7f   :  { %v85_v28 = vmul.f32 %v2372_v15, %v74_v26  ;;  %v83_v29 = vmul.f32 %v2372_v15, %v68_v27  ;;  %v38_v25 = vld [vmem:[%s3125_s2 + $0x48] sm:$0xff]  ;;  %2083 = vmatpush.xpose.msk.msrb.mxu0 %vm62_vm0, %v30_v24 }
  0x80   :  { %2093 = vmatpush.xpose.msk.msrb.mxu2 %vm62_vm0, %v38_v25 }
  0x81   :  { %v2388_v30 = vsub.f32 %v24_v4, %v85_v28  ;;  %v2390_v31 = vsub.f32 %v22_v5, %v83_v29 }
  0x83   :  { %v93_v32 = vmul.f32 %v2388_v30, %v2388_v30  ;;  %v91_v33 = vmul.f32 %v2390_v31, %v2390_v31 }
  0x85   :  { %v103_v34 = vsel %vm62_vm0, %v93_v32, 0.0  ;;  %v97_v35 = vsel %vm62_vm0, %v91_v33, 0.0 }
  0x86   :  { %104 = vadd.xlane.f32.xlu1 %v103_v34  ;;  %98 = vadd.xlane.f32.xlu2 %v97_v35 }
  0x92   :  { %180 = vperm.xlu0 %2198, %v170_v39  }
  0x9e   :  { %175 = vperm.xlu2 %2197, %v169_v42  }
  0x9f   :  { %185 = vperm.xlu1 %2199, %v171_v43  }
  0xa6   :  { %190 = vperm.xlu2 %2197, %v172_v45  }
  0xf1   :  { %v96_v49 = vpop.xlane.xlu2 %95  ;;  %v102_v50 = vpop.xlane.xlu0 %101 }
  0xf2   :  { %v106_v51 = vmul.f32 %v96_v49, %v2372_v15  ;;  %v108_v52 = vmul.f32 %v102_v50, %v2372_v15 }
  0xf4   :  { %v110_v53 = vadd.f32 1e-05, %v106_v51  ;;  %v112_v54 = vadd.f32 1e-05, %v108_v52  ;;  %v35_v52 = vld [vmem:[%s3125_s2 + $0x30] sm:$0xff] }
  0xf6   :  { %2202 = vrsqrt.f32 %v110_v53  ;;  %vm120_vm3 = vweird.f32 %v110_v53  ;;  %vm140_vm6 = vweird.f32 %v112_v54 }
  0xf7   :  { %2204 = vrsqrt.f32 %v112_v54 }
  0xf9   :  { %v105_v55 = vpop.xlane.xlu1 %104  ;;  %v99_v56 = vpop.xlane.xlu2 %98 }
  0xfa   :  { %v109_v57 = vmul.f32 %v105_v55, %v2372_v15  ;;  %v107_v58 = vmul.f32 %v99_v56, %v2372_v15  ;;  %v36_v55 = vld [vmem:[%s3125_s2 + $0x38] sm:$0xff] }
  0xfb   :  { %v40_v56 = vld [vmem:[%s3125_s2 + $0x58] sm:$0xff] }
  0xfc   :  { %v2203_v60 = vpop.eup %2202  ;;  %v113_v61 = vadd.f32 1e-05, %v109_v57  ;;  %v111_v62 = vadd.f32 1e-05, %v107_v58 }
  0xfd   :  { %v2205_v63 = vpop.eup %2204  ;;  %v115_v0 = vmul.f32 %v2203_v60, %v110_v53  ;;  %vm121_vm2 = vweird.f32 %v2203_v60  ;;  %v39_v53 = vld [vmem:[%s3125_s2 + $0x50] sm:$0xff] }
  0xfe   :  { %v135_v1 = vmul.f32 %v2205_v63, %v112_v54  ;;  %2206 = vrsqrt.f32 %v113_v61  ;;  %vm122_vm4 = vmor %vm120_vm3, %vm121_vm2  ;;  %vm141_vm7 = vweird.f32 %v2205_v63  ;;  %vm130_vm8 = vweird.f32 %v111_v62  ;;  %v32_v54 = vld [vmem:[%s3125_s2 + $0x18] sm:$0xff] }
  0xff   :  { %v116_v2 = vmul.f32 %v2203_v60, %v115_v0  ;;  %2208 = vrsqrt.f32 %v111_v62  ;;  %vm142_vm10 = vmor %vm140_vm6, %vm141_vm7  ;;  %vm150_vm11 = vweird.f32 %v113_v61 }
 0x100   :  { %v136_v4 = vmul.f32 %v2205_v63, %v135_v1 }
 0x101   :  { %v117_v3 = vmul.f32 0.5, %v116_v2  ;;  %v176_v28 = vpop.permute.xlu2 %175 }
 0x102   :  { %v137_v10 = vmul.f32 0.5, %v136_v4 }
 0x103   :  { %v118_v5 = vsub.f32 1.5, %v117_v3 }
 0x104   :  { %v2207_v6 = vpop.eup %2206  ;;  %v138_v19 = vsub.f32 1.5, %v137_v10  ;;  %v181_v40 = vpop.permute.xlu0 %180 }
 0x105   :  { %v2209_v7 = vpop.eup %2208  ;;  %v119_v8 = vmul.f32 %v2203_v60, %v118_v5  ;;  %v145_v9 = vmul.f32 %v2207_v6, %v113_v61  ;;  %vm151_vm12 = vweird.f32 %v2207_v6 }
 0x106   :  { %v125_v11 = vmul.f32 %v2209_v7, %v111_v62  ;;  %vm131_vm5 = vweird.f32 %v2209_v7  ;;  %v139_v29 = vmul.f32 %v2205_v63, %v138_v19  ;;  %vm152_vm13 = vmor %vm150_vm11, %vm151_vm12 }
 0x107   :  { %v123_v13 = vsel %vm122_vm4, %v2203_v60, %v119_v8  ;;  %v146_v14 = vmul.f32 %v2207_v6, %v145_v9  ;;  %vm132_vm9 = vmor %vm130_vm8, %vm131_vm5 }
 0x108   :  { %v126_v16 = vmul.f32 %v2209_v7, %v125_v11  ;;  %v154_v17 = vmul.f32 %v123_v13, %v2378_v21  ;;  %v143_v37 = vsel %vm142_vm10, %v2205_v63, %v139_v29  ;;  %v42_v29 = vld [vmem:[%s3125_s2 + $0x68] sm:$0xff] }
 0x109   :  { %v147_v26 = vmul.f32 0.5, %v146_v14  ;;  %v156_v41 = vmul.f32 %v143_v37, %v2376_v20  ;;  %v191_v50 = vpop.permute.xlu2 %190 }
 0x10a   :  { %v127_v22 = vmul.f32 0.5, %v126_v16  ;;  %v159_v23 = vmul.f32 %v158_v12, %v154_v17 }
 0x10b   :  { %v148_v34 = vsub.f32 1.5, %v147_v26  ;;  %v161_v45 = vmul.f32 %v158_v12, %v156_v41 }
 0x10c   :  { %v128_v27 = vsub.f32 1.5, %v127_v22  ;;  %v164_v21 = vadd.f32 %v163_v18, %v159_v23 }
 0x10d   :  { %v149_v39 = vmul.f32 %v2207_v6, %v148_v34  ;;  %v166_v47 = vadd.f32 %v163_v18, %v161_v45 }
 0x10e   :  { %v129_v32 = vmul.f32 %v2209_v7, %v128_v27  ;;  %v2442_v33 = vadd.f32 %v176_v28, %v164_v21 }
 0x10f   :  { %v153_v44 = vsel %vm152_vm13, %v2207_v6, %v149_v39 }
 0x110   :  { %2061 = vmatmul.msk.f32.vlgmr.msra.gmra.mxu0 %vm62_vm0, %v2442_v33  ;;  %2066 = vmatmul.msk.f32.vlgmr.msra.gmra.mxu1 %vm62_vm0, %v2442_v33  ;;  %v133_v35 = vsel %vm132_vm9, %v2209_v7, %v129_v32 }
 0x111   :  { %2071 = vmatmul.msk.f32.vlgmr.msra.gmra.mxu2 %vm62_vm0, %v2442_v33  ;;  %v155_v36 = vmul.f32 %v133_v35, %v2390_v31  ;;  %v157_v31 = vmul.f32 %v153_v44, %v2388_v30  ;;  %v186_v46 = vpop.permute.xlu1 %185  ;;  %v31_v30 = vld [vmem:[%s3125_s2 + $0x10] sm:$0xff]  ;;  %2111 = vmatpush.xpose.msk.msra.mxu1 %vm62_vm0, %v35_v52 }
 0x112   :  { %v195_v49 = vadd.f32 %v186_v46, %v166_v47  ;;  %2106 = vmatpush.xpose.msk.msra.mxu0 %vm62_vm0, %v31_v30  ;;  %2116 = vmatpush.xpose.msk.msra.mxu2 %vm62_vm0, %v39_v53 }
 0x113   :  { %v160_v38 = vmul.f32 %v158_v12, %v155_v36  ;;  %v162_v48 = vmul.f32 %v158_v12, %v157_v31  ;;  %v54_v31 = vld [vmem:[%s3127_s4] sm:$0xff] }
 0x115   :  { %v165_v42 = vadd.f32 %v163_v18, %v160_v38  ;;  %v167_v20 = vadd.f32 %v163_v18, %v162_v48 }
 0x117   :  { %v194_v43 = vadd.f32 %v181_v40, %v165_v42  ;;  %v196_v51 = vadd.f32 %v191_v50, %v167_v20 }
 0x119   :  { %2062 = vmatmul.msk.f32.gmra.mxu0 %vm62_vm0, %v194_v43  ;;  %2067 = vmatmul.msk.f32.gmra.mxu1 %vm62_vm0, %v194_v43 }
 0x11a   :  { %2072 = vmatmul.msk.f32.gmra.mxu2 %vm62_vm0, %v194_v43 }
 0x121   :  { %2063 = vmatmul.msk.f32.gmra.mxu0 %vm62_vm0, %v195_v49  ;;  %2068 = vmatmul.msk.f32.gmra.mxu1 %vm62_vm0, %v195_v49 }
 0x122   :  { %2073 = vmatmul.msk.f32.gmra.mxu2 %vm62_vm0, %v195_v49 }
 0x129   :  { %2064 = vmatmul.msk.f32.gmra.mxu0 %vm62_vm0, %v196_v51  ;;  %2069 = vmatmul.msk.f32.gmra.mxu1 %vm62_vm0, %v196_v51 }
 0x12a   :  { %2074 = vmatmul.msk.f32.gmra.mxu2 %vm62_vm0, %v196_v51 }
 0x131   :  { %2084 = vmatmul.msk.f32.vlgmr.msrb.gmra.mxu0 %vm62_vm0, %v2442_v33  ;;  %2089 = vmatmul.msk.f32.vlgmr.msrb.gmra.mxu1 %vm62_vm0, %v2442_v33 }
 0x132   :  { %2094 = vmatmul.msk.f32.vlgmr.msrb.gmra.mxu2 %vm62_vm0, %v2442_v33  ;;  %2129 = vmatpush.xpose.msk.msrb.mxu0 %vm62_vm0, %v32_v54 }
 0x133   :  { %2134 = vmatpush.xpose.msk.msrb.mxu1 %vm62_vm0, %v36_v55  ;;  %2139 = vmatpush.xpose.msk.msrb.mxu2 %vm62_vm0, %v40_v56  ;;  %v56_v55 = vld [vmem:[%s3127_s4 + $0x10] sm:$0xff] }
 0x139   :  { %2085 = vmatmul.msk.f32.gmra.mxu0 %vm62_vm0, %v194_v43  ;;  %2090 = vmatmul.msk.f32.gmra.mxu1 %vm62_vm0, %v194_v43 }
 0x13a   :  { %2095 = vmatmul.msk.f32.gmra.mxu2 %vm62_vm0, %v194_v43 }
 0x141   :  { %2086 = vmatmul.msk.f32.gmra.mxu0 %vm62_vm0, %v195_v49  ;;  %2091 = vmatmul.msk.f32.gmra.mxu1 %vm62_vm0, %v195_v49 }
 0x142   :  { %2096 = vmatmul.msk.f32.gmra.mxu2 %vm62_vm0, %v195_v49 }
 0x149   :  { %2087 = vmatmul.msk.f32.gmra.mxu0 %vm62_vm0, %v196_v51  ;;  %2092 = vmatmul.msk.f32.gmra.mxu1 %vm62_vm0, %v196_v51 }
 0x14a   :  { %2097 = vmatmul.msk.f32.gmra.mxu2 %vm62_vm0, %v196_v51 }
 0x151   :  { %2107 = vmatmul.msk.f32.vlgmr.msra.gmra.mxu0 %vm62_vm0, %v2442_v33  ;;  %2112 = vmatmul.msk.f32.vlgmr.msra.gmra.mxu1 %vm62_vm0, %v2442_v33 }
 0x152   :  { %2117 = vmatmul.msk.f32.vlgmr.msra.gmra.mxu2 %vm62_vm0, %v2442_v33  ;;  %1418 = vmatpush.msra.mxu0 %v42_v29 }
 0x159   :  { %2108 = vmatmul.msk.f32.gmra.mxu0 %vm62_vm0, %v194_v43  ;;  %2113 = vmatmul.msk.f32.gmra.mxu1 %vm62_vm0, %v194_v43 }
 0x15a   :  { %2118 = vmatmul.msk.f32.gmra.mxu2 %vm62_vm0, %v194_v43 }
 0x161   :  { %2109 = vmatmul.msk.f32.gmra.mxu0 %vm62_vm0, %v195_v49  ;;  %2114 = vmatmul.msk.f32.gmra.mxu1 %vm62_vm0, %v195_v49 }
 0x162   :  { %2119 = vmatmul.msk.f32.gmra.mxu2 %vm62_vm0, %v195_v49 }
 0x169   :  { %2110 = vmatmul.msk.f32.gmra.mxu0 %vm62_vm0, %v196_v51  ;;  %2115 = vmatmul.msk.f32.gmra.mxu1 %vm62_vm0, %v196_v51 }
 0x16a   :  { %2120 = vmatmul.msk.f32.gmra.mxu2 %vm62_vm0, %v196_v51 }
 0x171   :  { %2130 = vmatmul.msk.f32.vlgmr.msrb.gmra.mxu0 %vm62_vm0, %v2442_v33  ;;  %2135 = vmatmul.msk.f32.vlgmr.msrb.gmra.mxu1 %vm62_vm0, %v2442_v33 }
 0x172   :  { %2140 = vmatmul.msk.f32.vlgmr.msrb.gmra.mxu2 %vm62_vm0, %v2442_v33 }
 0x179   :  { %2131 = vmatmul.msk.f32.gmra.mxu0 %vm62_vm0, %v194_v43  ;;  %2136 = vmatmul.msk.f32.gmra.mxu1 %vm62_vm0, %v194_v43 }
 0x17a   :  { %2141 = vmatmul.msk.f32.gmra.mxu2 %vm62_vm0, %v194_v43 }
 0x181   :  { %2132 = vmatmul.msk.f32.gmra.mxu0 %vm62_vm0, %v195_v49  ;;  %2137 = vmatmul.msk.f32.gmra.mxu1 %vm62_vm0, %v195_v49 }
 0x182   :  { %2142 = vmatmul.msk.f32.gmra.mxu2 %vm62_vm0, %v195_v49  ;;  %v55_v49 = vld [vmem:[%s3127_s4 + $0x8] sm:$0xff] }
 0x189   :  { %2133 = vmatmul.msk.f32.gmra.mxu0 %vm62_vm0, %v196_v51  ;;  %2138 = vmatmul.msk.f32.gmra.mxu1 %vm62_vm0, %v196_v51 }
 0x18a   :  { %2143 = vmatmul.msk.f32.gmra.mxu2 %vm62_vm0, %v196_v51 }
 0x18d   :  { %v229_v57 = vpop.f32.mrf.mxu0  ;;  %v261_v58 = vpop.f32.mrf.mxu1 }
 0x194   :  { %v293_v59 = vpop.f32.mrf.mxu2 }
 0x196   :  { %v232_v60 = vpop.f32.mrf.mxu0  ;;  %v264_v61 = vpop.f32.mrf.mxu1 }
 0x197   :  { %2075 = vmatpush.xpose.msk.msra.mxu3 %vm305_vm14, %v264_v61 }
 0x19b   :  { %2076 = vmatpush.xpose.msk.msra.mxu3 %vm305_vm14, %v261_v58 }
 0x19d   :  { %v296_v62 = vpop.f32.mrf.mxu2 }
 0x19e   :  { %1295 = vmatpush.msra.mxu2 %v296_v62  ;;  %v235_v63 = vpop.f32.mrf.mxu0  ;;  %v267_v0 = vpop.f32.mrf.mxu1  ;;  %2077 = vmatmul.msk.f32.vlgmr.msra.gmra.mxu3 %vm305_vm14, %v229_v57 }
 0x1a0   :  { %1296 = vmatpush.msra.mxu2 %v293_v59  ;;  %v57_v59 = vld [vmem:[%s3127_s4 + $0x18] sm:$0xff] }
 0x1a5   :  { %v299_v1 = vpop.f32.mrf.mxu2 }
 0x1a6   :  { %v238_v2 = vpop.f32.mrf.mxu0  ;;  %v270_v3 = vpop.f32.mrf.mxu1  ;;  %2078 = vmatmul.msk.f32.gmra.mxu3 %vm305_vm14, %v232_v60 }
 0x1a7   :  { %2079 = vmatpush.xpose.msk.msrb.mxu3 %vm305_vm14, %v270_v3 }
 0x1ab   :  { %2080 = vmatpush.xpose.msk.msrb.mxu3 %vm305_vm14, %v267_v0 }
 0x1ad   :  { %v302_v4 = vpop.f32.mrf.mxu2 }
 0x1ae   :  { %1324 = vmatpush.msra.mxu1 %v302_v4  ;;  %2081 = vmatmul.msk.f32.vlgmr.msrb.gmra.mxu3 %vm305_vm14, %v235_v63  ;;  %v396_v5 = vpop.f32.mrf.mxu0  ;;  %v428_v6 = vpop.f32.mrf.mxu1 }
 0x1b0   :  { %1325 = vmatpush.msra.mxu1 %v299_v1 }
 0x1b5   :  { %v460_v7 = vpop.f32.mrf.mxu2 }
 0x1b6   :  { %2082 = vmatmul.msk.f32.gmra.mxu3 %vm305_vm14, %v238_v2  ;;  %v399_v8 = vpop.f32.mrf.mxu0  ;;  %v431_v9 = vpop.f32.mrf.mxu1 }
 0x1b7   :  { %2098 = vmatpush.xpose.msk.msra.mxu3 %vm305_vm14, %v431_v9 }
 0x1bb   :  { %2099 = vmatpush.xpose.msk.msra.mxu3 %vm305_vm14, %v428_v6 }
 0x1bd   :  { %v463_v10 = vpop.f32.mrf.mxu2 }
 0x1be   :  { %1353 = vmatpush.msrb.mxu2 %v463_v10  ;;  %v402_v11 = vpop.f32.mrf.mxu0  ;;  %v434_v12 = vpop.f32.mrf.mxu1  ;;  %2100 = vmatmul.msk.f32.vlgmr.msra.gmra.mxu3 %vm305_vm14, %v396_v5 }
 0x1c0   :  { %1354 = vmatpush.msrb.mxu2 %v460_v7 }
 0x1c5   :  { %v466_v13 = vpop.f32.mrf.mxu2 }
 0x1c6   :  { %v405_v14 = vpop.f32.mrf.mxu0  ;;  %v437_v16 = vpop.f32.mrf.mxu1  ;;  %2101 = vmatmul.msk.f32.gmra.mxu3 %vm305_vm14, %v399_v8 }
 0x1c7   :  { %2102 = vmatpush.xpose.msk.msrb.mxu3 %vm305_vm14, %v437_v16 }
 0x1cb   :  { %2103 = vmatpush.xpose.msk.msrb.mxu3 %vm305_vm14, %v434_v12 }
 0x1cd   :  { %v469_v17 = vpop.f32.mrf.mxu2 }
 0x1ce   :  { %2104 = vmatmul.msk.f32.vlgmr.msrb.gmra.mxu3 %vm305_vm14, %v402_v11  ;;  %v594_v18 = vpop.f32.mrf.mxu1  ;;  %v562_v19 = vpop.f32.mrf.mxu0 }
 0x1d5   :  { %v2546_v22 = vpop.f32.mrf.mxu2 }
 0x1d6   :  { %2105 = vmatmul.msk.f32.gmra.mxu3 %vm305_vm14, %v405_v14  ;;  %v597_v23 = vpop.f32.mrf.mxu1  ;;  %v565_v24 = vpop.f32.mrf.mxu0 }
 0x1d7   :  { %2121 = vmatpush.xpose.msk.msra.mxu3 %vm305_vm14, %v597_v23 }
 0x1db   :  { %2122 = vmatpush.xpose.msk.msra.mxu3 %vm305_vm14, %v594_v18 }
 0x1dd   :  { %v2551_v25 = vpop.f32.mrf.mxu2 }
 0x1de   :  { %v600_v26 = vpop.f32.mrf.mxu1  ;;  %2123 = vmatmul.msk.f32.vlgmr.msra.gmra.mxu3 %vm305_vm14, %v562_v19  ;;  %v568_v27 = vpop.f32.mrf.mxu0 }
 0x1e5   :  { %v632_v21 = vpop.f32.mrf.mxu2 }
 0x1e6   :  { %v603_v28 = vpop.f32.mrf.mxu1  ;;  %2124 = vmatmul.msk.f32.gmra.mxu3 %vm305_vm14, %v565_v24  ;;  %v571_v32 = vpop.f32.mrf.mxu0 }
 0x1e7   :  { %2125 = vmatpush.xpose.msk.msrb.mxu3 %vm305_vm14, %v603_v28 }
 0x1eb   :  { %2126 = vmatpush.xpose.msk.msrb.mxu3 %vm305_vm14, %v600_v26 }
 0x1ed   :  { %v635_v33 = vpop.f32.mrf.mxu2 }
 0x1ee   :  { %2127 = vmatmul.msk.f32.vlgmr.msrb.gmra.mxu3 %vm305_vm14, %v568_v27  ;;  %v760_v34 = vpop.f32.mrf.mxu1  ;;  %v728_v37 = vpop.f32.mrf.mxu0 }
 0x1f5   :  { %v2561_v35 = vpop.f32.mrf.mxu2 }
 0x1f6   :  { %2128 = vmatmul.msk.f32.gmra.mxu3 %vm305_vm14, %v571_v32  ;;  %v763_v36 = vpop.f32.mrf.mxu1  ;;  %v731_v40 = vpop.f32.mrf.mxu0 }
 0x1f7   :  { %2144 = vmatpush.xpose.msk.msra.mxu3 %vm305_vm14, %v763_v36 }
 0x1fb   :  { %2145 = vmatpush.xpose.msk.msra.mxu3 %vm305_vm14, %v760_v34 }
 0x1fd   :  { %v2566_v38 = vpop.f32.mrf.mxu2 }
 0x1fe   :  { %v766_v39 = vpop.f32.mrf.mxu1  ;;  %2146 = vmatmul.msk.f32.vlgmr.msra.gmra.mxu3 %vm305_vm14, %v728_v37  ;;  %v734_v43 = vpop.f32.mrf.mxu0 }
 0x205   :  { %v798_v41 = vpop.f32.mrf.mxu2 }
 0x206   :  { %v769_v42 = vpop.f32.mrf.mxu1  ;;  %2147 = vmatmul.msk.f32.gmra.mxu3 %vm305_vm14, %v731_v40  ;;  %v737_v45 = vpop.f32.mrf.mxu0 }
 0x207   :  { %2148 = vmatpush.xpose.msk.msrb.mxu3 %vm305_vm14, %v769_v42 }
 0x20b   :  { %2149 = vmatpush.xpose.msk.msrb.mxu3 %vm305_vm14, %v766_v39 }
 0x20d   :  { %v801_v44 = vpop.f32.mrf.mxu2 }
 0x20e   :  { %1625 = vmatpush.msrb.mxu0 %v801_v44  ;;  %2150 = vmatmul.msk.f32.vlgmr.msrb.gmra.mxu3 %vm305_vm14, %v734_v43 }
 0x20f   :  { %1382 = vmatpush.msra.mxu3 %v469_v17 }
 0x210   :  { %1626 = vmatpush.msrb.mxu0 %v798_v41  ;;  %v58_v41 = vld [vmem:[%s3127_s4 + $0x20] sm:$0xff] }
 0x211   :  { %1383 = vmatpush.msra.mxu3 %v466_v13 }
 0x213   :  { %1522 = vmatpush.msrb.mxu3 %v635_v33 }
 0x215   :  { %1523 = vmatpush.msrb.mxu3 %v632_v21 }
 0x216   :  { %2151 = vmatmul.msk.f32.gmra.mxu3 %vm305_vm14, %v737_v45 }
 0x221   :  { %v335_v46 = vpop.f32.mrf.mxu3 }
 0x222   :  { %v874_v47 = vadd.f32 %v335_v46, %v54_v31 }
 0x224   :  { %v891_v48 = vsel %vm890_vm15, %v874_v47, -inf }
 0x225   :  { %892 = vmax.xlane.f32.xlu2 %v891_v48 }
 0x229   :  { %v338_v20 = vpop.f32.mrf.mxu3 }
 0x22a   :  { %v875_v50 = vadd.f32 %v338_v20, %v55_v49 }
 0x22c   :  { %v894_v51 = vsel %vm890_vm15, %v875_v50, -inf }
 0x22d   :  { %895 = vmax.xlane.f32.xlu1 %v894_v51 }
 0x231   :  { %v370_v30 = vpop.f32.mrf.mxu3 }
 0x232   :  { %v2582_v52 = vadd.f32 %v370_v30, %v54_v31 }
 0x234   :  { %v915_v30 = vsel %vm890_vm15, %v2582_v52, -inf }
 0x239   :  { %v373_v53 = vpop.f32.mrf.mxu3 }
 0x23a   :  { %v2584_v54 = vadd.f32 %v373_v53, %v55_v49  ;;  %v59_v49 = vld [vmem:[%s3127_s4 + $0x28] sm:$0xff] }
 0x241   :  { %v501_v56 = vpop.f32.mrf.mxu3 }
 0x242   :  { %v876_v57 = vadd.f32 %v501_v56, %v56_v55  ;;  %v60_v56 = vld [vmem:[%s3127_s4 + $0x30] sm:$0xff] }
 0x244   :  { %v897_v58 = vsel %vm890_vm15, %v876_v57, -inf }
 0x245   :  { %898 = vmax.xlane.f32.xlu0 %v897_v58 }
 0x249   :  { %v504_v60 = vpop.f32.mrf.mxu3 }
 0x24a   :  { %v877_v61 = vadd.f32 %v504_v60, %v57_v59 }
 0x24c   :  { %v900_v62 = vsel %vm890_vm15, %v877_v61, -inf }
 0x24d   :  { %901 = vmax.xlane.f32.xlu2 %v900_v62 }
 0x251   :  { %v536_v63 = vpop.f32.mrf.mxu3 }
 0x252   :  { %v884_v0 = vadd.f32 %v536_v63, %v56_v55 }
 0x254   :  { %v921_v1 = vsel %vm890_vm15, %v884_v0, -inf }
 0x255   :  { %922 = vmax.xlane.f32.xlu1 %v921_v1 }
 0x259   :  { %v539_v2 = vpop.f32.mrf.mxu3 }
 0x25a   :  { %v885_v3 = vadd.f32 %v539_v2, %v57_v59  ;;  %v918_v59 = vsel %vm890_vm15, %v2584_v54, -inf }
 0x25c   :  { %v924_v4 = vsel %vm890_vm15, %v885_v3, -inf }
 0x25d   :  { %925 = vmax.xlane.f32.xlu2 %v924_v4 }
 0x261   :  { %v667_v8 = vpop.f32.mrf.mxu3 }
 0x269   :  { %v670_v14 = vpop.f32.mrf.mxu3 }
 0x271   :  { %v702_v18 = vpop.f32.mrf.mxu3 }
 0x272   :  { %v2615_v42 = vadd.f32 %v702_v18, %v58_v41 }
 0x274   :  { %v927_v48 = vsel %vm890_vm15, %v2615_v42, -inf }
 0x279   :  { %v705_v26 = vpop.f32.mrf.mxu3 }
 0x27a   :  { %v2626_v20 = vadd.f32 %v705_v26, %v59_v49 }
 0x27c   :  { %v930_v55 = vsel %vm890_vm15, %v2626_v20, -inf }
 0x281   :  { %v833_v33 = vpop.f32.mrf.mxu3 }
 0x282   :  { %v2641_v58 = vadd.f32 %v833_v33, %v60_v56 }
 0x284   :  { %v909_v62 = vsel %vm890_vm15, %v2641_v58, -inf }
 0x289   :  { %v836_v45 = vpop.f32.mrf.mxu3 }
 0x291   :  { %v868_v51 = vpop.f32.mrf.mxu3 }
 0x298   :  { %v893_v5 = vpop.xlane.xlu2 %892 }
 0x299   :  { %v939_v6 = vsub.f32 %v874_v47, %v893_v5  ;;  %v871_v63 = vpop.f32.mrf.mxu3 }
 0x29b   :  { %v955_v7 = vmul.f32 1.442695, %v939_v6  ;;  %v2664_v6 = vadd.f32 %v868_v51, %v60_v56 }
 0x29d   :  { %2210 = vpow2.f32 %v955_v7  ;;  %v933_v7 = vsel %vm890_vm15, %v2664_v6, -inf }
 0x2a0   :  { %v896_v9 = vpop.xlane.xlu1 %895 }
 0x2a1   :  { %v940_v10 = vsub.f32 %v875_v50, %v896_v9 }
 0x2a3   :  { %v2596_v11 = vpop.eup %2210  ;;  %v957_v12 = vmul.f32 1.442695, %v940_v10 }
 0x2a4   :  { %v987_v13 = vsel %vm890_vm15, %v2596_v11, 0.0 }
 0x2a5   :  { %2212 = vpow2.f32 %v957_v12  ;;  %988 = vadd.xlane.f32.xlu1 %v987_v13 }
 0x2ab   :  { %v2600_v16 = vpop.eup %2212 }
 0x2ac   :  { %v990_v17 = vsel %vm890_vm15, %v2600_v16, 0.0 }
 0x2ad   :  { %991 = vadd.xlane.f32.xlu2 %v990_v17 }
 0x2b8   :  { %v899_v19 = vpop.xlane.xlu0 %898 }
 0x2b9   :  { %v941_v23 = vsub.f32 %v876_v57, %v899_v19  ;;  %v2639_v57 = vadd.f32 %v667_v8, %v58_v41 }
 0x2bb   :  { %v959_v24 = vmul.f32 1.442695, %v941_v23  ;;  %v903_v60 = vsel %vm890_vm15, %v2639_v57, -inf }
 0x2bd   :  { %2214 = vpow2.f32 %v959_v24 }
 0x2c0   :  { %v902_v27 = vpop.xlane.xlu2 %901 }
 0x2c1   :  { %v942_v21 = vsub.f32 %v877_v61, %v902_v27  ;;  %v61_v61 = vld [vmem:[%s3127_s4 + $0x38] sm:$0xff] }
 0x2c2   :  { %v2654_v1 = vadd.f32 %v836_v45, %v61_v61  ;;  %v2656_v2 = vadd.f32 %v871_v63, %v61_v61 }
 0x2c3   :  { %v2604_v28 = vpop.eup %2214  ;;  %v961_v29 = vmul.f32 1.442695, %v942_v21 }
 0x2c4   :  { %v993_v32 = vsel %vm890_vm15, %v2604_v28, 0.0  ;;  %v912_v4 = vsel %vm890_vm15, %v2654_v1, -inf  ;;  %v936_v5 = vsel %vm890_vm15, %v2656_v2, -inf }
 0x2c5   :  { %2216 = vpow2.f32 %v961_v29  ;;  %994 = vadd.xlane.f32.xlu0 %v993_v32 }
 0x2c8   :  { %v923_v34 = vpop.xlane.xlu1 %922 }
 0x2c9   :  { %v949_v36 = vsub.f32 %v884_v0, %v923_v34  ;;  %v2652_v0 = vadd.f32 %v670_v14, %v59_v49 }
 0x2cb   :  { %v2608_v37 = vpop.eup %2216  ;;  %v975_v39 = vmul.f32 1.442695, %v949_v36 }
 0x2cc   :  { %v996_v40 = vsel %vm890_vm15, %v2608_v37, 0.0 }
 0x2cd   :  { %2218 = vpow2.f32 %v975_v39  ;;  %997 = vadd.xlane.f32.xlu1 %v996_v40 }
 0x2d0   :  { %v926_v43 = vpop.xlane.xlu2 %925 }
 0x2d1   :  { %v950_v44 = vsub.f32 %v885_v3, %v926_v43  ;;  %v906_v3 = vsel %vm890_vm15, %v2652_v0, -inf }
 0x2d3   :  { %v2617_v31 = vpop.eup %2218  ;;  %v977_v46 = vmul.f32 1.442695, %v950_v44 }
 0x2d4   :  { %v1017_v47 = vsel %vm890_vm15, %v2617_v31, 0.0 }
 0x2d5   :  { %2220 = vpow2.f32 %v977_v46  ;;  %1018 = vadd.xlane.f32.xlu2 %v1017_v47  ;;  %928 = vmax.xlane.f32.xlu1 %v927_v48 }
 0x2db   :  { %v2628_v50 = vpop.eup %2220 }
 0x2dc   :  { %v1020_v53 = vsel %vm890_vm15, %v2628_v50, 0.0 }
 0x2dd   :  { %916 = vmax.xlane.f32.xlu2 %v915_v30  ;;  %1021 = vadd.xlane.f32.xlu0 %v1020_v53 }
 0x2de   :  { %931 = vmax.xlane.f32.xlu1 %v930_v55 }
 0x2e5   :  { %919 = vmax.xlane.f32.xlu2 %v918_v59  ;;  %904 = vmax.xlane.f32.xlu0 %v903_v60 }
 0x2e6   :  { %910 = vmax.xlane.f32.xlu1 %v909_v62 }
 0x2ed   :  { %907 = vmax.xlane.f32.xlu0 %v906_v3  ;;  %913 = vmax.xlane.f32.xlu2 %v912_v4 }
 0x2ee   :  { %937 = vmax.xlane.f32.xlu1 %v936_v5 }
 0x2f5   :  { %934 = vmax.xlane.f32.xlu0 %v933_v7 }
 0x318   :  { %v989_v8 = vpop.xlane.xlu1 %988 }
 0x319   :  { %2222 = vrcp.f32 %v989_v8  ;;  %v1046_v14 = vand.u32 2147483648, %v989_v8  ;;  %v1044_v18 = vand.u32 2147483647, %v989_v8  ;;  %vm1040_vm2 = vweird.f32 %v989_v8 }
 0x31b   :  { %v1047_v24 = vor.u32 1.1754944e-38, %v1046_v14  ;;  %vm1045_vm4 = vcmp.eq.f32.partialorder %v1044_v18, 8.507059e+37 }
 0x31f   :  { %v2223_v9 = vpop.eup %2222 }
 0x320   :  { %v1036_v10 = vmul.f32 %v2223_v9, %v989_v8  ;;  %v992_v12 = vpop.xlane.xlu2 %991  ;;  %vm1041_vm1 = vweird.f32 %v2223_v9 }
 0x321   :  { %2224 = vrcp.f32 %v992_v12  ;;  %vm1042_vm3 = vmor %vm1040_vm2, %vm1041_vm1  ;;  %v1061_v33 = vand.u32 2147483648, %v992_v12  ;;  %v1059_v36 = vand.u32 2147483647, %v992_v12  ;;  %vm1055_vm6 = vweird.f32 %v992_v12 }
 0x322   :  { %v1037_v13 = vsub.f32 1.0, %v1036_v10 }
 0x323   :  { %v1062_v40 = vor.u32 1.1754944e-38, %v1061_v33  ;;  %vm1060_vm8 = vcmp.eq.f32.partialorder %v1059_v36, 8.507059e+37 }
 0x324   :  { %v1038_v17 = vmul.f32 %v2223_v9, %v1037_v13 }
 0x326   :  { %v1039_v19 = vadd.f32 %v2223_v9, %v1038_v17 }
 0x327   :  { %v2225_v23 = vpop.eup %2224 }
 0x328   :  { %v1043_v26 = vsel %vm1042_vm3, %v2223_v9, %v1039_v19  ;;  %v1051_v27 = vmul.f32 %v2225_v23, %v992_v12  ;;  %vm1056_vm5 = vweird.f32 %v2225_v23 }
 0x329   :  { %v1048_v21 = vsel %vm1045_vm4, %v1047_v24, %v1043_v26  ;;  %vm1057_vm7 = vmor %vm1055_vm6, %vm1056_vm5 }
 0x32a   :  { %v1052_v29 = vsub.f32 1.0, %v1051_v27  ;;  %v1049_v32 = vmul.f32 %v2596_v11, %v1048_v21 }
 0x32c   :  { %v1053_v34 = vmul.f32 %v2225_v23, %v1052_v29  ;;  %2152 = vmatmul.msk.f32.vlgmr.msra.gmra.mxu2 %vm890_vm15, %v1049_v32 }
 0x32d   :  { %1493 = vmatpush.msra.mxu2 %v2551_v25 }
 0x32e   :  { %v1054_v39 = vadd.f32 %v2225_v23, %v1053_v34 }
 0x32f   :  { %1494 = vmatpush.msra.mxu2 %v2546_v22 }
 0x330   :  { %v1058_v41 = vsel %vm1057_vm7, %v2225_v23, %v1054_v39 }
 0x331   :  { %v1063_v43 = vsel %vm1060_vm8, %v1062_v40, %v1058_v41 }
 0x332   :  { %v1064_v44 = vmul.f32 %v2600_v16, %v1063_v43 }
 0x334   :  { %2153 = vmatmul.msk.f32.gmra.mxu2 %vm890_vm15, %v1064_v44 }
 0x338   :  { %v995_v11 = vpop.xlane.xlu0 %994 }
 0x339   :  { %2226 = vrcp.f32 %v995_v11  ;;  %v1076_v48 = vand.u32 2147483648, %v995_v11  ;;  %v1074_v51 = vand.u32 2147483647, %v995_v11  ;;  %vm1070_vm10 = vweird.f32 %v995_v11 }
 0x33b   :  { %v1077_v53 = vor.u32 1.1754944e-38, %v1076_v48  ;;  %vm1075_vm12 = vcmp.eq.f32.partialorder %v1074_v51, 8.507059e+37 }
 0x33f   :  { %v2227_v45 = vpop.eup %2226 }
 0x340   :  { %v1066_v46 = vmul.f32 %v2227_v45, %v995_v11  ;;  %v998_v47 = vpop.xlane.xlu1 %997  ;;  %vm1071_vm9 = vweird.f32 %v2227_v45 }
 0x341   :  { %2228 = vrcp.f32 %v998_v47  ;;  %vm1072_vm11 = vmor %vm1070_vm10, %vm1071_vm9  ;;  %v1091_v4 = vand.u32 2147483648, %v998_v47  ;;  %v1089_v7 = vand.u32 2147483647, %v998_v47  ;;  %vm1085_vm1 = vweird.f32 %v998_v47 }
 0x342   :  { %v1067_v25 = vsub.f32 1.0, %v1066_v46 }
 0x343   :  { %v1092_v10 = vor.u32 1.1754944e-38, %v1091_v4  ;;  %vm1090_vm3 = vcmp.eq.f32.partialorder %v1089_v7, 8.507059e+37 }
 0x344   :  { %v1068_v49 = vmul.f32 %v2227_v45, %v1067_v25 }
 0x346   :  { %v1069_v22 = vadd.f32 %v2227_v45, %v1068_v49 }
 0x347   :  { %v2229_v30 = vpop.eup %2228 }
 0x348   :  { %v1073_v55 = vsel %vm1072_vm11, %v2227_v45, %v1069_v22  ;;  %v1081_v16 = vmul.f32 %v2229_v30, %v998_v47  ;;  %v1019_v56 = vpop.xlane.xlu2 %1018  ;;  %v929_v59 = vpop.xlane.xlu1 %928  ;;  %vm1086_vm13 = vweird.f32 %v2229_v30 }
 0x349   :  { %v1078_v60 = vsel %vm1075_vm12, %v1077_v53, %v1073_v55  ;;  %2230 = vrcp.f32 %v1019_v56  ;;  %v951_v62 = vsub.f32 %v2615_v42, %v929_v59  ;;  %vm1087_vm2 = vmor %vm1085_vm1, %vm1086_vm13  ;;  %v1196_v24 = vand.u32 2147483648, %v1019_v56 }
 0x34a   :  { %v1082_v61 = vsub.f32 1.0, %v1081_v16  ;;  %v1079_v63 = vmul.f32 %v2604_v28, %v1078_v60  ;;  %v1194_v32 = vand.u32 2147483647, %v1019_v56  ;;  %vm1190_vm5 = vweird.f32 %v1019_v56 }
 0x34b   :  { %v979_v5 = vmul.f32 1.442695, %v951_v62  ;;  %v1197_v36 = vor.u32 1.1754944e-38, %v1196_v24 }
 0x34c   :  { %v1083_v3 = vmul.f32 %v2229_v30, %v1082_v61  ;;  %2156 = vmatmul.msk.f32.vlgmr.msrb.gmra.mxu2 %vm890_vm15, %v1079_v63  ;;  %vm1195_vm7 = vcmp.eq.f32.partialorder %v1194_v32, 8.507059e+37 }
 0x34d   :  { %2232 = vpow2.f32 %v979_v5 }
 0x34e   :  { %v1084_v8 = vadd.f32 %v2229_v30, %v1083_v3 }
 0x34f   :  { %v2231_v9 = vpop.eup %2230 }
 0x350   :  { %v1186_v12 = vmul.f32 %v2231_v9, %v1019_v56  ;;  %v2677_v13 = vpop.xlane.xlu0 %1021  ;;  %v917_v14 = vpop.xlane.xlu2 %916  ;;  %v1088_v42 = vsel %vm1087_vm2, %v2229_v30, %v1084_v8  ;;  %vm1191_vm4 = vweird.f32 %v2231_v9 }
 0x351   :  { %2234 = vrcp.f32 %v2677_v13  ;;  %v947_v28 = vsub.f32 %v2582_v52, %v917_v14  ;;  %v932_v17 = vpop.xlane.xlu1 %931  ;;  %v1093_v23 = vsel %vm1090_vm3, %v1092_v10, %v1088_v42  ;;  %vm1192_vm6 = vmor %vm1190_vm5, %vm1191_vm4  ;;  %v1211_v47 = vand.u32 2147483648, %v2677_v13 }
 0x352   :  { %v1187_v18 = vsub.f32 1.0, %v1186_v12  ;;  %v952_v19 = vsub.f32 %v2626_v20, %v932_v17  ;;  %v1094_v27 = vmul.f32 %v2608_v37, %v1093_v23  ;;  %v1209_v30 = vand.u32 2147483647, %v2677_v13 }
 0x353   :  { %v971_v26 = vmul.f32 1.442695, %v947_v28  ;;  %v2683_v21 = vpop.eup %2232  ;;  %vm1205_vm9 = vweird.f32 %v2677_v13  ;;  %v1212_v16 = vor.u32 1.1754944e-38, %v1211_v47 }
 0x354   :  { %v1188_v29 = vmul.f32 %v2231_v9, %v1187_v18  ;;  %v981_v33 = vmul.f32 1.442695, %v952_v19  ;;  %2157 = vmatmul.msk.f32.gmra.mxu2 %vm890_vm15, %v1094_v27  ;;  %v1023_v52 = vsel %vm890_vm15, %v2683_v21, 0.0  ;;  %vm1210_vm11 = vcmp.eq.f32.partialorder %v1209_v30, 8.507059e+37 }
 0x355   :  { %2236 = vpow2.f32 %v971_v26  ;;  %1024 = vadd.xlane.f32.xlu2 %v1023_v52 }
 0x356   :  { %v1189_v34 = vadd.f32 %v2231_v9, %v1188_v29  ;;  %2238 = vpow2.f32 %v981_v33 }
 0x357   :  { %v2235_v20 = vpop.eup %2234 }
 0x358   :  { %v1193_v37 = vsel %vm1192_vm6, %v2231_v9, %v1189_v34  ;;  %v1201_v39 = vmul.f32 %v2235_v20, %v2677_v13  ;;  %v920_v40 = vpop.xlane.xlu2 %919  ;;  %v905_v41 = vpop.xlane.xlu0 %904  ;;  %vm1206_vm8 = vweird.f32 %v2235_v20 }
 0x359   :  { %v1198_v43 = vsel %vm1195_vm7, %v1197_v36, %v1193_v37  ;;  %v948_v44 = vsub.f32 %v2584_v54, %v920_v40  ;;  %v943_v11 = vsub.f32 %v2639_v57, %v905_v41  ;;  %v911_v45 = vpop.xlane.xlu1 %910  ;;  %vm1207_vm10 = vmor %vm1205_vm9, %vm1206_vm8 }
 0x35a   :  { %v1202_v46 = vsub.f32 1.0, %v1201_v39  ;;  %v945_v25 = vsub.f32 %v2641_v58, %v911_v45  ;;  %v1199_v48 = vmul.f32 %v2617_v31, %v1198_v43 }
 0x35b   :  { %v2694_v49 = vpop.eup %2236  ;;  %v973_v51 = vmul.f32 1.442695, %v948_v44  ;;  %v963_v22 = vmul.f32 1.442695, %v943_v11 }
 0x35c   :  { %v2697_v53 = vpop.eup %2238  ;;  %v1203_v55 = vmul.f32 %v2235_v20, %v1202_v46  ;;  %v967_v54 = vmul.f32 1.442695, %v945_v25  ;;  %2158 = vmatmul.msk.f32.vlgmr.msra.gmra.mxu3 %vm890_vm15, %v1199_v48  ;;  %v1011_v57 = vsel %vm890_vm15, %v2694_v49, 0.0 }
 0x35d   :  { %2240 = vpow2.f32 %v973_v51  ;;  %1596 = vmatpush.msra.mxu3 %v2566_v38  ;;  %v1026_v31 = vsel %vm890_vm15, %v2697_v53, 0.0  ;;  %1012 = vadd.xlane.f32.xlu0 %v1011_v57 }
 0x35e   :  { %2242 = vpow2.f32 %v963_v22  ;;  %1027 = vadd.xlane.f32.xlu2 %v1026_v31  ;;  %v1204_v58 = vadd.f32 %v2235_v20, %v1203_v55 }
 0x35f   :  { %2244 = vpow2.f32 %v967_v54  ;;  %1597 = vmatpush.msra.mxu3 %v2561_v35 }
 0x360   :  { %v908_v56 = vpop.xlane.xlu0 %907  ;;  %v914_v59 = vpop.xlane.xlu2 %913  ;;  %v1208_v60 = vsel %vm1207_vm10, %v2235_v20, %v1204_v58  ;;  %v41_v58 = vld [vmem:[%s3125_s2 + $0x60] sm:$0xff] }
 0x361   :  { %v944_v38 = vsub.f32 %v2652_v0, %v908_v56  ;;  %v946_v61 = vsub.f32 %v2654_v1, %v914_v59  ;;  %v938_v62 = vpop.xlane.xlu1 %937  ;;  %v1213_v63 = vsel %vm1210_vm11, %v1212_v16, %v1208_v60  ;;  %1459 = vmatpush.msrb.mxu1 %v41_v58 }
 0x362   :  { %v954_v3 = vsub.f32 %v2656_v2, %v938_v62  ;;  %v1214_v4 = vmul.f32 %v2628_v50, %v1213_v63 }
 0x363   :  { %v2711_v5 = vpop.eup %2240  ;;  %v965_v7 = vmul.f32 1.442695, %v944_v38  ;;  %v969_v8 = vmul.f32 1.442695, %v946_v61 }
 0x364   :  { %v2713_v35 = vpop.eup %2242  ;;  %v985_v9 = vmul.f32 1.442695, %v954_v3  ;;  %2159 = vmatmul.msk.f32.gmra.mxu3 %vm890_vm15, %v1214_v4  ;;  %v1014_v0 = vsel %vm890_vm15, %v2711_v5, 0.0 }
 0x365   :  { %v2718_v10 = vpop.eup %2244  ;;  %2246 = vpow2.f32 %v965_v7  ;;  %1015 = vadd.xlane.f32.xlu0 %v1014_v0  ;;  %v999_v1 = vsel %vm890_vm15, %v2713_v35, 0.0 }
 0x366   :  { %2248 = vpow2.f32 %v969_v8  ;;  %v1005_v50 = vsel %vm890_vm15, %v2718_v10, 0.0  ;;  %1000 = vadd.xlane.f32.xlu1 %v999_v1 }
 0x367   :  { %2250 = vpow2.f32 %v985_v9  ;;  %1006 = vadd.xlane.f32.xlu2 %v1005_v50 }
 0x368   :  { %v935_v2 = vpop.xlane.xlu0 %934 }
 0x369   :  { %v953_v12 = vsub.f32 %v2664_v6, %v935_v2 }
 0x36b   :  { %v2725_v13 = vpop.eup %2246  ;;  %v983_v14 = vmul.f32 1.442695, %v953_v12 }
 0x36c   :  { %v2727_v42 = vpop.eup %2248  ;;  %v1002_v28 = vsel %vm890_vm15, %v2725_v13, 0.0 }
 0x36d   :  { %v2731_v17 = vpop.eup %2250  ;;  %2252 = vpow2.f32 %v983_v14  ;;  %v1008_v18 = vsel %vm890_vm15, %v2727_v42, 0.0 }
 0x36e   :  { %1009 = vadd.xlane.f32.xlu0 %v1008_v18  ;;  %1003 = vadd.xlane.f32.xlu1 %v1002_v28  ;;  %v1032_v19 = vsel %vm890_vm15, %v2731_v17, 0.0 }
 0x36f   :  { %1033 = vadd.xlane.f32.xlu2 %v1032_v19 }
 0x373   :  { %v2737_v6 = vpop.eup %2252 }
 0x374   :  { %v1029_v23 = vsel %vm890_vm15, %v2737_v6, 0.0 }
 0x376   :  { %1030 = vadd.xlane.f32.xlu1 %v1029_v23 }
 0x3af   :  { %v2741_v24 = vpop.f32.mrf.mxu2 }
 0x3b7   :  { %v2743_v26 = vpop.f32.mrf.mxu2 }
 0x3c8   :  { %v1025_v27 = vpop.xlane.xlu2 %1024 }
 0x3c9   :  { %2254 = vrcp.f32 %v1025_v27  ;;  %v1224_v36 = vand.u32 2147483647, %v1025_v27  ;;  %v1226_v37 = vand.u32 2147483648, %v1025_v27  ;;  %vm1220_vm13 = vweird.f32 %v1025_v27 }
 0x3cb   :  { %vm2757_vm2 = vcmp.eq.f32.partialorder %v1224_v36, 8.507059e+37  ;;  %v1227_v45 = vor.u32 1.1754944e-38, %v1226_v37 }
 0x3cf   :  { %v1356_v29 = vpop.f32.mrf.mxu2  ;;  %v2255_v32 = vpop.eup %2254 }
 0x3d0   :  { %2160 = vmatmul.msk.f32.vlgmr.msra.gmra.mxu0 %vm305_vm14, %v1356_v29  ;;  %v1013_v33 = vpop.xlane.xlu0 %1012  ;;  %v1216_v52 = vmul.f32 %v2255_v32, %v1025_v27  ;;  %vm1221_vm12 = vweird.f32 %v2255_v32 }
 0x3d1   :  { %v2746_v34 = vpop.xlane.xlu2 %1027  ;;  %2256 = vrcp.f32 %v1013_v33  ;;  %vm2753_vm1 = vmor %vm1220_vm13, %vm1221_vm12  ;;  %v1164_v54 = vand.u32 2147483647, %v1013_v33  ;;  %v1166_v57 = vand.u32 2147483648, %v1013_v33  ;;  %vm1160_vm5 = vweird.f32 %v1013_v33 }
 0x3d2   :  { %2258 = vrcp.f32 %v2746_v34  ;;  %v1217_v20 = vsub.f32 1.0, %v1216_v52  ;;  %v1241_v22 = vand.u32 2147483648, %v2746_v34  ;;  %v1239_v59 = vand.u32 2147483647, %v2746_v34 }
 0x3d3   :  { %vm1235_vm4 = vweird.f32 %v2746_v34  ;;  %vm2796_vm7 = vcmp.eq.f32.partialorder %v1164_v54, 8.507059e+37  ;;  %v1167_v9 = vor.u32 1.1754944e-38, %v1166_v57 }
 0x3d4   :  { %v1218_v39 = vmul.f32 %v2255_v32, %v1217_v20  ;;  %v1242_v61 = vor.u32 1.1754944e-38, %v1241_v22  ;;  %vm2801_vm9 = vcmp.eq.f32.partialorder %v1239_v59, 8.507059e+37 }
 0x3d6   :  { %v1219_v41 = vadd.f32 %v2255_v32, %v1218_v39 }
 0x3d7   :  { %v2749_v40 = vpop.eup %2256  ;;  %v1359_v47 = vpop.f32.mrf.mxu2 }
 0x3d8   :  { %v2751_v43 = vpop.eup %2258  ;;  %v1156_v46 = vmul.f32 %v2749_v40, %v1013_v33  ;;  %v2762_v25 = vpop.xlane.xlu0 %1015  ;;  %v1223_v48 = vsel %vm2753_vm1, %v2255_v32, %v1219_v41  ;;  %2161 = vmatmul.msk.f32.gmra.mxu0 %vm305_vm14, %v1359_v47  ;;  %vm1161_vm3 = vweird.f32 %v2749_v40 }
 0x3d9   :  { %v1231_v51 = vmul.f32 %v2751_v43, %v2746_v34  ;;  %2260 = vrcp.f32 %v2762_v25  ;;  %v2771_v30 = vpop.xlane.xlu1 %1000  ;;  %v1228_v16 = vsel %vm2757_vm2, %v1227_v45, %v1223_v48  ;;  %v1181_v63 = vand.u32 2147483648, %v2762_v25  ;;  %vm2792_vm6 = vmor %vm1160_vm5, %vm1161_vm3 }
 0x3da   :  { %v1157_v55 = vsub.f32 1.0, %v1156_v46  ;;  %v2773_v31 = vpop.xlane.xlu2 %1006  ;;  %2262 = vrcp.f32 %v2771_v30  ;;  %v1229_v3 = vmul.f32 %v2683_v21, %v1228_v16  ;;  %vm1175_vm8 = vweird.f32 %v2762_v25 }
 0x3db   :  { %v1232_v56 = vsub.f32 1.0, %v1231_v51  ;;  %2264 = vrcp.f32 %v2773_v31  ;;  %vm1236_vm10 = vweird.f32 %v2751_v43  ;;  %vm1130_vm11 = vweird.f32 %v2773_v31 }
 0x3dc   :  { %v1158_v60 = vmul.f32 %v2749_v40, %v1157_v55  ;;  %2170 = vmatmul.msk.f32.vlgmr.msrb.gmra.mxu3 %vm890_vm15, %v1229_v3  ;;  %v1134_v28 = vand.u32 2147483647, %v2773_v31  ;;  %v1136_v18 = vand.u32 2147483648, %v2773_v31  ;;  %v1182_v33 = vor.u32 1.1754944e-38, %v1181_v63  ;;  %vm2833_vm12 = vmor %vm1235_vm4, %vm1236_vm10 }
 0x3dd   :  { %v1233_v38 = vmul.f32 %v2751_v43, %v1232_v56  ;;  %v1106_v37 = vand.u32 2147483648, %v2771_v30  ;;  %v1104_v45 = vand.u32 2147483647, %v2771_v30  ;;  %vm1100_vm3 = vweird.f32 %v2771_v30 }
 0x3de   :  { %v1159_v62 = vadd.f32 %v2749_v40, %v1158_v60  ;;  %v1179_v55 = vand.u32 2147483647, %v2762_v25 }
 0x3df   :  { %v2790_v4 = vpop.eup %2260  ;;  %v1385_v0 = vpop.f32.mrf.mxu3  ;;  %v1234_v12 = vadd.f32 %v2751_v43, %v1233_v38  ;;  %v1107_v57 = vor.u32 1.1754944e-38, %v1106_v37 }
 0x3e0   :  { %v2263_v50 = vpop.eup %2262  ;;  %v1163_v21 = vsel %vm2792_vm6, %v2749_v40, %v1159_v62  ;;  %v1171_v2 = vmul.f32 %v2790_v4, %v2762_v25  ;;  %2162 = vmatmul.msk.f32.gmra.mxu0 %vm305_vm14, %v1385_v0  ;;  %vm1176_vm13 = vweird.f32 %v2790_v4 }
 0x3e1   :  { %v2265_v14 = vpop.eup %2264  ;;  %v1096_v19 = vmul.f32 %v2263_v50, %v2771_v30  ;;  %v2817_v23 = vpop.xlane.xlu0 %1009  ;;  %v1168_v20 = vsel %vm2796_vm7, %v1167_v9, %v1163_v21  ;;  %v1238_v44 = vsel %vm2833_vm12, %v2751_v43, %v1234_v12  ;;  %vm1101_vm1 = vweird.f32 %v2263_v50  ;;  %vm2854_vm4 = vmor %vm1175_vm8, %vm1176_vm13 }
 0x3e2   :  { %v2820_v27 = vpop.xlane.xlu1 %1003  ;;  %v1126_v29 = vmul.f32 %v2265_v14, %v2773_v31  ;;  %v1172_v32 = vsub.f32 1.0, %v1171_v2  ;;  %2266 = vrcp.f32 %v2817_v23  ;;  %v2824_v52 = vpop.xlane.xlu2 %1033  ;;  %vm1131_vm2 = vweird.f32 %v2265_v14  ;;  %vm1102_vm5 = vmor %vm1100_vm3, %vm1101_vm1 }
 0x3e3   :  { %v1097_v36 = vsub.f32 1.0, %v1096_v19  ;;  %2268 = vrcp.f32 %v2824_v52  ;;  %v1169_v46 = vmul.f32 %v2694_v49, %v1168_v20  ;;  %v1243_v48 = vsel %vm2801_vm9, %v1242_v61, %v1238_v44  ;;  %vm1132_vm6 = vmor %vm1130_vm11, %vm1131_vm2 }
 0x3e4   :  { %v1127_v40 = vsub.f32 1.0, %v1126_v29  ;;  %v1173_v41 = vmul.f32 %v2790_v4, %v1172_v32  ;;  %2270 = vrcp.f32 %v2820_v27  ;;  %v1137_v49 = vor.u32 1.1754944e-38, %v1136_v18 }
 0x3e5   :  { %v1098_v11 = vmul.f32 %v2263_v50, %v1097_v36  ;;  %2154 = vmatmul.msk.f32.vlgmr.msra.gmra.mxu1 %vm890_vm15, %v1169_v46  ;;  %v1244_v58 = vmul.f32 %v2697_v53, %v1243_v48  ;;  %vm1105_vm7 = vcmp.eq.f32.partialorder %v1104_v45, 8.507059e+37  ;;  %vm1135_vm8 = vcmp.eq.f32.partialorder %v1134_v28, 8.507059e+37 }
 0x3e6   :  { %v1128_v34 = vmul.f32 %v2265_v14, %v1127_v40  ;;  %v1174_v22 = vadd.f32 %v2790_v4, %v1173_v41  ;;  %vm1180_vm9 = vcmp.eq.f32.partialorder %v1179_v55, 8.507059e+37  ;;  %v1151_v63 = vand.u32 2147483648, %v2817_v23 }
 0x3e7   :  { %v1099_v47 = vadd.f32 %v2263_v50, %v1098_v11  ;;  %v1388_v51 = vpop.f32.mrf.mxu3  ;;  %2171 = vmatmul.msk.f32.gmra.mxu3 %vm890_vm15, %v1244_v58  ;;  %vm1145_vm11 = vweird.f32 %v2817_v23  ;;  %v1121_v21 = vand.u32 2147483648, %v2820_v27  ;;  %v1149_v12 = vand.u32 2147483647, %v2817_v23 }
 0x3e8   :  { %v2267_v30 = vpop.eup %2266  ;;  %v1129_v54 = vadd.f32 %v2265_v14, %v1128_v34  ;;  %2163 = vmatmul.msk.f32.gmra.mxu0 %vm305_vm14, %v1388_v51  ;;  %v1178_v59 = vsel %vm2854_vm4, %v2790_v4, %v1174_v22  ;;  %vm1115_vm1 = vweird.f32 %v2820_v27  ;;  %v1269_v48 = vand.u32 2147483647, %v2824_v52 }
 0x3e9   :  { %v1103_v16 = vsel %vm1102_vm5, %v2263_v50, %v1099_v47  ;;  %v1141_v56 = vmul.f32 %v2267_v30, %v2817_v23  ;;  %v2872_v60 = vpop.eup %2268  ;;  %v1183_v7 = vsel %vm1180_vm9, %v1182_v33, %v1178_v59  ;;  %vm1146_vm10 = vweird.f32 %v2267_v30 }
 0x3ea   :  { %v2867_v25 = vpop.xlane.xlu1 %1030  ;;  %v1133_v38 = vsel %vm1132_vm6, %v2265_v14, %v1129_v54  ;;  %v1108_v53 = vsel %vm1105_vm7, %v1107_v57, %v1103_v16  ;;  %v2271_v31 = vpop.eup %2270  ;;  %v1261_v8 = vmul.f32 %v2872_v60, %v2824_v52  ;;  %v1184_v9 = vmul.f32 %v2711_v5, %v1183_v7  ;;  %vm1147_vm13 = vmor %vm1145_vm11, %vm1146_vm10 }
 0x3eb   :  { %2272 = vrcp.f32 %v2867_v25  ;;  %v1138_v61 = vsel %vm1135_vm8, %v1137_v49, %v1133_v38  ;;  %v1142_v62 = vsub.f32 1.0, %v1141_v56  ;;  %v1111_v3 = vmul.f32 %v2271_v31, %v2820_v27 }
 0x3ec   :  { %v1109_v0 = vmul.f32 %v2713_v35, %v1108_v53  ;;  %v1139_v50 = vmul.f32 %v2718_v10, %v1138_v61  ;;  %vm1116_vm12 = vweird.f32 %v2271_v31  ;;  %v1119_v5 = vand.u32 2147483647, %v2820_v27 }
 0x3ed   :  { %v1143_v4 = vmul.f32 %v2267_v30, %v1142_v62  ;;  %v1112_v1 = vsub.f32 1.0, %v1111_v3  ;;  %2155 = vmatmul.msk.f32.gmra.mxu1 %vm890_vm15, %v1184_v9  ;;  %v1152_v35 = vor.u32 1.1754944e-38, %v1151_v63  ;;  %v1262_v10 = vsub.f32 1.0, %v1261_v8  ;;  %vm1117_vm3 = vmor %vm1115_vm1, %vm1116_vm12  ;;  %v2934_v9 = vld [vmem:[%s3126_s3 + $0x40] sm:$0xff] }
 0x3ee   :  { %2168 = vmatmul.msk.f32.vlgmr.msra.gmra.mxu2 %vm890_vm15, %v1109_v0  ;;  %vm1150_vm2 = vcmp.eq.f32.partialorder %v1149_v12, 8.507059e+37  ;;  %v1122_v23 = vor.u32 1.1754944e-38, %v1121_v21  ;;  %v1254_v20 = vand.u32 2147483647, %v2867_v25  ;;  %v1256_v36 = vand.u32 2147483648, %v2867_v25 }
 0x3ef   :  { %v1144_v2 = vadd.f32 %v2267_v30, %v1143_v4  ;;  %v1113_v28 = vmul.f32 %v2271_v31, %v1112_v1  ;;  %2176 = vmatmul.msk.f32.vlgmr.msra.gmra.mxu3 %vm890_vm15, %v1139_v50  ;;  %vm1120_vm4 = vcmp.eq.f32.partialorder %v1119_v5, 8.507059e+37  ;;  %v1263_v39 = vmul.f32 %v2872_v60, %v1262_v10  ;;  %v2291_v1 = vld [vmem:[%s3123_s0] sm:$0xff]  ;;  %v2292_v10 = vld [vmem:[%s3123_s0 + $0x8] sm:$0xff] }
 0x3f0   :  { %vm1250_vm6 = vweird.f32 %v2867_v25  ;;  %v1257_v45 = vor.u32 1.1754944e-38, %v1256_v36  ;;  %vm1255_vm8 = vcmp.eq.f32.partialorder %v1254_v20, 8.507059e+37  ;;  %vm1266_vm9 = vweird.f32 %v2872_v60 }
 0x3f1   :  { %v2273_v14 = vpop.eup %2272  ;;  %v1148_v19 = vsel %vm1147_vm13, %v2267_v30, %v1144_v2  ;;  %v1114_v29 = vadd.f32 %v2271_v31, %v1113_v28  ;;  %v1264_v46 = vadd.f32 %v2872_v60, %v1263_v39  ;;  %vm1265_vm10 = vweird.f32 %v2824_v52 }
 0x3f2   :  { %v1246_v18 = vmul.f32 %v2273_v14, %v2867_v25  ;;  %v1153_v33 = vsel %vm1150_vm2, %v1152_v35, %v1148_v19  ;;  %vm1251_vm5 = vweird.f32 %v2273_v14  ;;  %vm1267_vm11 = vmor %vm1265_vm10, %vm1266_vm9  ;;  %vm1270_vm12 = vcmp.eq.f32.partialorder %v1269_v48, 8.507059e+37 }
 0x3f3   :  { %v1118_v37 = vsel %vm1117_vm3, %v2271_v31, %v1114_v29  ;;  %v1154_v44 = vmul.f32 %v2727_v42, %v1153_v33  ;;  %vm1252_vm7 = vmor %vm1250_vm6, %vm1251_vm5  ;;  %v1683_v0 = vperm.slane %v2934_v9, 2 }
 0x3f4   :  { %v1247_v32 = vsub.f32 1.0, %v1246_v18  ;;  %v1123_v41 = vsel %vm1120_vm4, %v1122_v23, %v1118_v37  ;;  %v2293_v37 = vld [vmem:[%s3123_s0 + $0x10] sm:$0xff] }
 0x3f5   :  { %v1124_v27 = vmul.f32 %v2725_v13, %v1123_v41  ;;  %2164 = vmatmul.msk.f32.vlgmr.msrb.gmra.mxu1 %vm305_vm14, %v2741_v24  ;;  %v1271_v13 = vand.u32 2147483648, %v2824_v52  ;;  %v1268_v24 = vsel %vm1267_vm11, %v2872_v60, %v1264_v46  ;;  %v43_v52 = vld [vmem:[%s3125_s2 + $0x70] sm:$0xff]  ;;  %v2294_v46 = vld [vmem:[%s3123_s0 + $0x18] sm:$0xff] }
 0x3f6   :  { %v1248_v40 = vmul.f32 %v2273_v14, %v1247_v32  ;;  %1558 = vmatpush.msrb.mxu2 %v43_v52 }
 0x3f7   :  { %2169 = vmatmul.msk.f32.gmra.mxu2 %vm890_vm15, %v1124_v27  ;;  %2177 = vmatmul.msk.f32.gmra.mxu3 %vm890_vm15, %v1154_v44  ;;  %v1272_v51 = vor.u32 1.1754944e-38, %v1271_v13 }
 0x3f8   :  { %v1249_v11 = vadd.f32 %v2273_v14, %v1248_v40 }
 0x3f9   :  { %v1273_v22 = vsel %vm1270_vm12, %v1272_v51, %v1268_v24 }
 0x3fa   :  { %v1253_v34 = vsel %vm1252_vm7, %v2273_v14, %v1249_v11  ;;  %v1274_v43 = vmul.f32 %v2731_v17, %v1273_v22 }
 0x3fb   :  { %v1258_v47 = vsel %vm1255_vm8, %v1257_v45, %v1253_v34 }
 0x3fc   :  { %v1259_v42 = vmul.f32 %v2737_v6, %v1258_v47  ;;  %v44_v6 = vld [vmem:[%s3125_s2 + $0x78] sm:$0xff]  ;;  %s2048_s2 = sshll.u32 %s3128_s5, 4  ;;  %s2049_s2 = int_to_ptr.hbm [resolvable:$true] %s2048_s2 }
 0x3fd   :  { %2165 = vmatmul.msk.f32.gmra.mxu1 %vm305_vm14, %v2743_v26 }
 0x3fe   :  { %2178 = vmatmul.msk.f32.vlgmr.msrb.gmra.mxu0 %vm890_vm15, %v1259_v42  ;;  %1661 = vmatpush.msra.mxu1 %v44_v6 }
 0x406   :  { %2179 = vmatmul.msk.f32.gmra.mxu0 %vm890_vm15, %v1274_v43 }
 0x44d   :  { %v1420_v55 = vpop.f32.mrf.mxu0 }
 0x455   :  { %v1423_v26 = vpop.f32.mrf.mxu0 }
 0x45d   :  { %v1426_v57 = vpop.f32.mrf.mxu0 }
 0x45f   :  { %v1525_v30 = vpop.f32.mrf.mxu3 }
 0x462   :  { %v1327_v54 = vpop.f32.mrf.mxu1 }
 0x463   :  { %2166 = vmatmul.msk.f32.gmra.mxu1 %vm305_vm14, %v1327_v54 }
 0x465   :  { %v1429_v56 = vpop.f32.mrf.mxu0 }
 0x46a   :  { %v1528_v49 = vpop.f32.mrf.mxu3  ;;  %v1330_v17 = vpop.f32.mrf.mxu1 }
 0x46b   :  { %2167 = vmatmul.msk.f32.gmra.mxu1 %vm305_vm14, %v1330_v17 }
 0x471   :  { %v1496_v58 = vpop.f32.mrf.mxu2 }
 0x472   :  { %2172 = vmatmul.msk.f32.vlgmr.msrb.gmra.mxu2 %vm305_vm14, %v1496_v58  ;;  %v1599_v16 = vpop.f32.mrf.mxu3  ;;  %v1461_v53 = vpop.f32.mrf.mxu1 }
 0x473   :  { %2180 = vmatmul.msk.f32.vlgmr.msra.gmra.mxu1 %vm305_vm14, %v1599_v16  ;;  %v1462_v3 = vadd.f32 %v1461_v53, %v1420_v55 }
 0x47a   :  { %v1499_v25 = vpop.f32.mrf.mxu2  ;;  %v1602_v59 = vpop.f32.mrf.mxu3 }
 0x47b   :  { %2173 = vmatmul.msk.f32.gmra.mxu2 %vm305_vm14, %v1499_v25  ;;  %2181 = vmatmul.msk.f32.gmra.mxu1 %vm305_vm14, %v1602_v59  ;;  %v1628_v60 = vpop.f32.mrf.mxu0  ;;  %v1464_v31 = vpop.f32.mrf.mxu1 }
 0x47c   :  { %v1465_v12 = vadd.f32 %v1464_v31, %v1423_v26  ;;  %v48_v31 = vld [vmem:[%s3126_s3 + $0x18] sm:$0xff] }
 0x47d   :  { %1811 = vmatpush.msrb.mxu3 %v48_v31 }
 0x483   :  { %2174 = vmatmul.msk.f32.gmra.mxu2 %vm305_vm14, %v1525_v30  ;;  %2182 = vmatmul.msk.f32.gmra.mxu1 %vm305_vm14, %v1628_v60  ;;  %v1631_v38 = vpop.f32.mrf.mxu0 }
 0x48b   :  { %2175 = vmatmul.msk.f32.gmra.mxu2 %vm305_vm14, %v1528_v49  ;;  %2183 = vmatmul.msk.f32.gmra.mxu1 %vm305_vm14, %v1631_v38 }
 0x4e0   :  { %v1467_v61 = vpop.f32.mrf.mxu1 }
 0x4e1   :  { %v1468_v19 = vadd.f32 %v1467_v61, %v1426_v57 }
 0x4e8   :  { %v1470_v62 = vpop.f32.mrf.mxu1 }
 0x4e9   :  { %v1471_v40 = vadd.f32 %v1470_v62, %v1429_v56  ;;  %v47_v62 = vld [vmem:[%s3126_s3 + $0x10] sm:$0xff] }
 0x4ea   :  { %1812 = vmatpush.msrb.mxu3 %v47_v62 }
 0x4f0   :  { %v1663_v63 = vpop.f32.mrf.mxu1 }
 0x4f5   :  { %v1560_v7 = vpop.f32.mrf.mxu2 }
 0x4f6   :  { %v1572_v4 = vadd.f32 %v1560_v7, %v1462_v3  ;;  %v45_v3 = vld [vmem:[%s3126_s3] sm:$0xff] }
 0x4f8   :  { %v1675_v8 = vadd.f32 %v1663_v63, %v1572_v4  ;;  %v1666_v21 = vpop.f32.mrf.mxu1  ;;  %v46_v63 = vld [vmem:[%s3126_s3 + $0x8] sm:$0xff] }
 0x4f9   :  { %1813 = vmatpush.msrb.mxu3 %v46_v63 }
 0x4fa   :  { %v1679_v50 = vadd.f32 %v2291_v1, %v1675_v8 }
 0x4fb   :  { %1814 = vmatpush.msrb.mxu3 %v45_v3 }
 0x4fc   :  { %v2940_v2 = vadd.f32 %v1683_v0, %v1679_v50 }
 0x4fe   :  { %v1563_v14 = vpop.f32.mrf.mxu2  ;;  %v1688_v28 = vsel %vm62_vm0, %v2940_v2, 0.0 }
 0x4ff   :  { %v1573_v5 = vadd.f32 %v1563_v14, %v1465_v12  ;;  %1689 = vadd.xlane.f32.xlu0 %v1688_v28 }
 0x500   :  { %v1669_v23 = vpop.f32.mrf.mxu1 }
 0x501   :  { %v1676_v35 = vadd.f32 %v1666_v21, %v1573_v5 }
 0x503   :  { %v1680_v18 = vadd.f32 %v2292_v10, %v1676_v35 }
 0x505   :  { %v2947_v29 = vadd.f32 %v1683_v0, %v1680_v18  ;;  %v1776_v18 = vperm.slane %v2934_v9, 3 }
 0x506   :  { %v1566_v32 = vpop.f32.mrf.mxu2 }
 0x507   :  { %v1574_v33 = vadd.f32 %v1566_v32, %v1468_v19  ;;  %v1691_v20 = vsel %vm62_vm0, %v2947_v29, 0.0 }
 0x508   :  { %1692 = vadd.xlane.f32.xlu1 %v1691_v20  ;;  %v1672_v45 = vpop.f32.mrf.mxu1  ;;  %v1781_v20 = vperm.slane %v2934_v9, 4 }
 0x509   :  { %v1677_v36 = vadd.f32 %v1669_v23, %v1574_v33 }
 0x50b   :  { %v1681_v39 = vadd.f32 %v2293_v37, %v1677_v36 }
 0x50d   :  { %v2954_v41 = vadd.f32 %v1683_v0, %v1681_v39 }
 0x50e   :  { %v1569_v27 = vpop.f32.mrf.mxu2 }
 0x50f   :  { %v1575_v44 = vadd.f32 %v1569_v27, %v1471_v40  ;;  %v1694_v11 = vsel %vm62_vm0, %v2954_v41, 0.0 }
 0x510   :  { %1695 = vadd.xlane.f32.xlu2 %v1694_v11 }
 0x511   :  { %v1678_v34 = vadd.f32 %v1672_v45, %v1575_v44 }
 0x513   :  { %v1682_v13 = vadd.f32 %v2294_v46, %v1678_v34 }
 0x515   :  { %v2961_v47 = vadd.f32 %v1683_v0, %v1682_v13 }
 0x517   :  { %v1697_v42 = vsel %vm62_vm0, %v2961_v47, 0.0 }
 0x518   :  { %1698 = vadd.xlane.f32.xlu0 %v1697_v42 }
 0x572   :  { %v1690_v48 = vpop.xlane.xlu0 %1689 }
 0x573   :  { %v1700_v24 = vmul.f32 %v1690_v48, %v2372_v15 }
 0x575   :  { %v1704_v51 = vsub.f32 %v2940_v2, %v1700_v24 }
 0x577   :  { %v1708_v22 = vmul.f32 %v1704_v51, %v1704_v51 }
 0x579   :  { %v1712_v43 = vsel %vm62_vm0, %v1708_v22, 0.0 }
 0x57a   :  { %1713 = vadd.xlane.f32.xlu1 %v1712_v43 }
 0x57b   :  { %v1693_v6 = vpop.xlane.xlu1 %1692 }
 0x57c   :  { %v1701_v52 = vmul.f32 %v1693_v6, %v2372_v15 }
 0x57e   :  { %v2970_v55 = vsub.f32 %v2947_v29, %v1701_v52 }
 0x580   :  { %v1709_v30 = vmul.f32 %v2970_v55, %v2970_v55 }
 0x582   :  { %v1715_v54 = vsel %vm62_vm0, %v1709_v30, 0.0 }
 0x583   :  { %v1696_v26 = vpop.xlane.xlu2 %1695  ;;  %1716 = vadd.xlane.f32.xlu2 %v1715_v54 }
 0x584   :  { %v1702_v49 = vmul.f32 %v1696_v26, %v2372_v15 }
 0x586   :  { %v2977_v17 = vsub.f32 %v2954_v41, %v1702_v49 }
 0x588   :  { %v1710_v57 = vmul.f32 %v2977_v17, %v2977_v17 }
 0x58a   :  { %v1718_v58 = vsel %vm62_vm0, %v1710_v57, 0.0 }
 0x58b   :  { %1719 = vadd.xlane.f32.xlu0 %v1718_v58  ;;  %v1699_v16 = vpop.xlane.xlu0 %1698 }
 0x58c   :  { %v1703_v56 = vmul.f32 %v1699_v16, %v2372_v15 }
 0x58e   :  { %v2984_v25 = vsub.f32 %v2961_v47, %v1703_v56 }
 0x590   :  { %v1711_v59 = vmul.f32 %v2984_v25, %v2984_v25 }
 0x592   :  { %v1721_v60 = vsel %vm62_vm0, %v1711_v59, 0.0 }
 0x593   :  { %1722 = vadd.xlane.f32.xlu1 %v1721_v60 }
 0x5ed   :  { %v1714_v38 = vpop.xlane.xlu1 %1713 }
 0x5ee   :  { %v1724_v53 = vmul.f32 %v1714_v38, %v2372_v15 }
 0x5f0   :  { %v1728_v61 = vadd.f32 1e-05, %v1724_v53  ;;  %v1786_v53 = vperm.slane %v2934_v9, 5 }
 0x5f2   :  { %2274 = vrsqrt.f32 %v1728_v61  ;;  %vm1738_vm15 = vweird.f32 %v1728_v61 }
 0x5f6   :  { %v1717_v7 = vpop.xlane.xlu2 %1716 }
 0x5f7   :  { %v1725_v4 = vmul.f32 %v1717_v7, %v2372_v15 }
 0x5f8   :  { %v2275_v8 = vpop.eup %2274 }
 0x5f9   :  { %v1733_v0 = vmul.f32 %v2275_v8, %v1728_v61  ;;  %v1729_v1 = vadd.f32 1e-05, %v1725_v4  ;;  %vm1739_vm14 = vweird.f32 %v2275_v8 }
 0x5fa   :  { %vm1740_vm13 = vmor %vm1738_vm15, %vm1739_vm14 }
 0x5fb   :  { %v1734_v50 = vmul.f32 %v2275_v8, %v1733_v0  ;;  %2276 = vrsqrt.f32 %v1729_v1  ;;  %vm1748_vm2 = vweird.f32 %v1729_v1 }
 0x5fd   :  { %v1735_v21 = vmul.f32 0.5, %v1734_v50 }
 0x5fe   :  { %v1720_v12 = vpop.xlane.xlu0 %1719 }
 0x5ff   :  { %v1736_v14 = vsub.f32 1.5, %v1735_v21  ;;  %v1726_v28 = vmul.f32 %v1720_v12, %v2372_v15 }
 0x601   :  { %v2277_v5 = vpop.eup %2276  ;;  %v1737_v35 = vmul.f32 %v2275_v8, %v1736_v14  ;;  %v1730_v10 = vadd.f32 1e-05, %v1726_v28 }
 0x602   :  { %v1743_v19 = vmul.f32 %v2277_v5, %v1729_v1  ;;  %vm1749_vm1 = vweird.f32 %v2277_v5 }
 0x603   :  { %v1741_v23 = vsel %vm1740_vm13, %v2275_v8, %v1737_v35  ;;  %2278 = vrsqrt.f32 %v1730_v10  ;;  %vm1750_vm3 = vmor %vm1748_vm2, %vm1749_vm1  ;;  %vm1758_vm5 = vweird.f32 %v1730_v10 }
 0x604   :  { %v1772_v32 = vmul.f32 %v1741_v23, %v1704_v51  ;;  %v1744_v33 = vmul.f32 %v2277_v5, %v1743_v19  ;;  %v52_v23 = vld [vmem:[%s3126_s3 + $0x38] sm:$0xff] }
 0x605   :  { %2017 = vmatpush.xpose.msra.mxu0 %v52_v23 }
 0x606   :  { %v1777_v36 = vmul.f32 %v1776_v18, %v1772_v32  ;;  %v1745_v37 = vmul.f32 0.5, %v1744_v33  ;;  %v1723_v39 = vpop.xlane.xlu1 %1722 }
 0x607   :  { %v1727_v40 = vmul.f32 %v1723_v39, %v2372_v15 }
 0x608   :  { %v1746_v27 = vsub.f32 1.5, %v1745_v37  ;;  %v1782_v44 = vadd.f32 %v1781_v20, %v1777_v36 }
 0x609   :  { %v2279_v11 = vpop.eup %2278  ;;  %v1731_v45 = vadd.f32 1e-05, %v1727_v40 }
 0x60a   :  { %v1747_v34 = vmul.f32 %v2277_v5, %v1746_v27  ;;  %v1753_v46 = vmul.f32 %v2279_v11, %v1730_v10  ;;  %2184 = vmatmul.msk.f32.vlgmr.msrb.gmra.mxu3 %vm62_vm0, %v1782_v44  ;;  %vm1759_vm4 = vweird.f32 %v2279_v11 }
 0x60b   :  { %2280 = vrsqrt.f32 %v1731_v45  ;;  %vm1760_vm6 = vmor %vm1758_vm5, %vm1759_vm4  ;;  %vm1768_vm8 = vweird.f32 %v1731_v45 }
 0x60c   :  { %v1751_v13 = vsel %vm1750_vm3, %v2277_v5, %v1747_v34  ;;  %v1754_v42 = vmul.f32 %v2279_v11, %v1753_v46 }
 0x60d   :  { %v1773_v48 = vmul.f32 %v1751_v13, %v2970_v55 }
 0x60e   :  { %v1755_v24 = vmul.f32 0.5, %v1754_v42 }
 0x60f   :  { %v1778_v51 = vmul.f32 %v1776_v18, %v1773_v48 }
 0x610   :  { %v1756_v22 = vsub.f32 1.5, %v1755_v24 }
 0x611   :  { %v2281_v15 = vpop.eup %2280  ;;  %v1783_v43 = vadd.f32 %v1781_v20, %v1778_v51 }
 0x612   :  { %v1757_v6 = vmul.f32 %v2279_v11, %v1756_v22  ;;  %v1763_v52 = vmul.f32 %v2281_v15, %v1731_v45  ;;  %vm1769_vm7 = vweird.f32 %v2281_v15 }
 0x613   :  { %2185 = vmatmul.msk.f32.gmra.mxu3 %vm62_vm0, %v1783_v43  ;;  %vm1770_vm9 = vmor %vm1768_vm8, %vm1769_vm7  ;;  %v50_v43 = vld [vmem:[%s3126_s3 + $0x28] sm:$0xff] }
 0x614   :  { %v1761_v30 = vsel %vm1760_vm6, %v2279_v11, %v1757_v6  ;;  %v1764_v54 = vmul.f32 %v2281_v15, %v1763_v52  ;;  %v51_v11 = vld [vmem:[%s3126_s3 + $0x30] sm:$0xff] }
 0x615   :  { %v1774_v26 = vmul.f32 %v1761_v30, %v2977_v17  ;;  %2018 = vmatpush.xpose.msra.mxu0 %v51_v11 }
 0x616   :  { %v1765_v49 = vmul.f32 0.5, %v1764_v54 }
 0x617   :  { %v1779_v57 = vmul.f32 %v1776_v18, %v1774_v26 }
 0x618   :  { %v1766_v58 = vsub.f32 1.5, %v1765_v49 }
 0x619   :  { %v1784_v55 = vadd.f32 %v1781_v20, %v1779_v57  ;;  %2019 = vmatpush.xpose.msra.mxu0 %v50_v43 }
 0x61a   :  { %v1767_v16 = vmul.f32 %v2281_v15, %v1766_v58 }
 0x61b   :  { %2186 = vmatmul.msk.f32.gmra.mxu3 %vm62_vm0, %v1784_v55 }
 0x61c   :  { %v1771_v56 = vsel %vm1770_vm9, %v2281_v15, %v1767_v16  ;;  %v49_v16 = vld [vmem:[%s3126_s3 + $0x20] sm:$0xff]  ;;  %s2323_s3 = smov [#allocation2]  }
 0x61d   :  { %v1775_v59 = vmul.f32 %v1771_v56, %v2984_v25  ;;  %2020 = vmatpush.xpose.msra.mxu0 %v49_v16  ;;  %s2046_s28 = sshll.u32 %s2323_s3, 4  ;;  %s2047_s28 = int_to_ptr.vmem [resolvable:$true] %s2046_s28 }
 0x61f   :  { %v1780_v60 = vmul.f32 %v1776_v18, %v1775_v59 }
 0x621   :  { %v1785_v38 = vadd.f32 %v1781_v20, %v1780_v60 }
 0x623   :  { %2187 = vmatmul.msk.f32.gmra.mxu3 %vm62_vm0, %v1785_v38 }
 0x68d   :  { %v1816_v17 = vpop.f32.mrf.mxu3 }
 0x68e   :  { %v3015_v31 = vadd.f32 %v1816_v17, %v1786_v53 }
 0x690   :  { %v3018_v61 = vmul.f32 0.70710677, %v3015_v31 }
 0x692   :  { %v1836_v62 = vmul.f32 %v3018_v61, %v3018_v61 }
 0x694   :  { %v3022_v63 = vmin.f32 %v1836_v62, 16.0 }
 0x696   :  { %v1838_v3 = vmul.f32 2.1237322e-06, %v3022_v63  ;;  %v1849_v25 = vmul.f32 3.8918573e-05, %v3022_v63  ;;  %v1819_v7 = vpop.f32.mrf.mxu3 }
 0x697   :  { %v3026_v4 = vadd.f32 %v1819_v7, %v1786_v53 }
 0x698   :  { %v1839_v8 = vadd.f32 0.00028619796, %v1838_v3  ;;  %v1850_v0 = vadd.f32 0.001143296, %v1849_v25 }
 0x699   :  { %v3029_v1 = vmul.f32 0.70710677, %v3026_v4 }
 0x69a   :  { %v1840_v50 = vmul.f32 %v1839_v8, %v3022_v63  ;;  %v1851_v21 = vmul.f32 %v1850_v0, %v3022_v63 }
 0x69b   :  { %v1876_v12 = vmul.f32 %v3029_v1, %v3029_v1 }
 0x69c   :  { %v1852_v14 = vadd.f32 0.014752088, %v1851_v21  ;;  %v1841_v28 = vadd.f32 0.0036580483, %v1840_v50 }
 0x69d   :  { %v3035_v5 = vmin.f32 %v1876_v12, 16.0 }
 0x69e   :  { %v1853_v35 = vmul.f32 %v1852_v14, %v3022_v63  ;;  %v1822_v10 = vpop.f32.mrf.mxu3  ;;  %v1842_v20 = vmul.f32 %v1841_v28, %v3022_v63 }
 0x69f   :  { %v1878_v18 = vmul.f32 2.1237322e-06, %v3035_v5  ;;  %v3039_v19 = vadd.f32 %v1822_v10, %v1786_v53  ;;  %v1889_v32 = vmul.f32 3.8918573e-05, %v3035_v5 }
 0x6a0   :  { %v1854_v33 = vadd.f32 0.112945676, %v1853_v35  ;;  %v1843_v46 = vadd.f32 0.05243302, %v1842_v20 }
 0x6a1   :  { %v1879_v36 = vadd.f32 0.00028619796, %v1878_v18  ;;  %v3047_v37 = vmul.f32 0.70710677, %v3039_v19  ;;  %v1890_v40 = vadd.f32 0.001143296, %v1889_v32 }
 0x6a2   :  { %v1855_v39 = vmul.f32 %v1854_v33, %v3022_v63  ;;  %v1844_v54 = vmul.f32 %v1843_v46, %v3022_v63 }
 0x6a3   :  { %v1880_v27 = vmul.f32 %v1879_v36, %v3035_v5  ;;  %v1916_v44 = vmul.f32 %v3047_v37, %v3047_v37  ;;  %v1891_v34 = vmul.f32 %v1890_v40, %v3035_v5 }
 0x6a4   :  { %v1856_v45 = vadd.f32 0.4994258, %v1855_v39  ;;  %v1845_v60 = vadd.f32 0.18741608, %v1844_v54 }
 0x6a5   :  { %v3057_v13 = vmin.f32 %v1916_v44, 16.0  ;;  %v1881_v48 = vadd.f32 0.0036580483, %v1880_v27  ;;  %v1892_v51 = vadd.f32 0.014752088, %v1891_v34 }
 0x6a6   :  { %v1857_v42 = vmul.f32 %v1856_v45, %v3022_v63  ;;  %v1825_v24 = vpop.f32.mrf.mxu3  ;;  %v1846_v21 = vmul.f32 %v1845_v60, %v3022_v63 }
 0x6a7   :  { %v1918_v22 = vmul.f32 2.1237322e-06, %v3057_v13  ;;  %v1929_v15 = vmul.f32 3.8918573e-05, %v3057_v13  ;;  %v3065_v52 = vadd.f32 %v1825_v24, %v1786_v53  ;;  %v1893_v30 = vmul.f32 %v1892_v51, %v3035_v5 }
 0x6a8   :  { %v1858_v6 = vadd.f32 1.0, %v1857_v42  ;;  %v1882_v57 = vmul.f32 %v1881_v48, %v3035_v5  ;;  %v1847_v27 = vadd.f32 1.1283791, %v1846_v21 }
 0x6a9   :  { %v1919_v26 = vadd.f32 0.00028619796, %v1918_v22  ;;  %v1930_v49 = vadd.f32 0.001143296, %v1929_v15  ;;  %v3076_v56 = vmul.f32 0.70710677, %v3065_v52 }
 0x6aa   :  { %2282 = vrcp.f32 %v1858_v6  ;;  %v1894_v59 = vadd.f32 0.112945676, %v1893_v30  ;;  %v1883_v3 = vadd.f32 0.05243302, %v1882_v57  ;;  %v1870_v23 = vand.u32 2147483648, %v1858_v6 }
 0x6ab   :  { %v1920_v58 = vmul.f32 %v1919_v26, %v3057_v13  ;;  %v1931_v55 = vmul.f32 %v1930_v49, %v3057_v13  ;;  %v1956_v17 = vmul.f32 %v3076_v56, %v3076_v56  ;;  %v1868_v44 = vand.u32 2147483647, %v1858_v6 }
 0x6ac   :  { %v1895_v62 = vmul.f32 %v1894_v59, %v3035_v5  ;;  %v1884_v32 = vmul.f32 %v1883_v3, %v3035_v5  ;;  %vm1864_vm11 = vweird.f32 %v1858_v6  ;;  %v1871_v42 = vor.u32 1.1754944e-38, %v1870_v23 }
 0x6ad   :  { %v1921_v38 = vadd.f32 0.0036580483, %v1920_v58  ;;  %v1932_v53 = vadd.f32 0.014752088, %v1931_v55  ;;  %v3083_v0 = vmin.f32 %v1956_v17, 16.0  ;;  %v1848_v15 = vmul.f32 %v1847_v27, %v3018_v61 }
 0x6ae   :  { %v1896_v50 = vadd.f32 0.4994258, %v1895_v62  ;;  %v1885_v48 = vadd.f32 0.18741608, %v1884_v32  ;;  %vm1869_vm14 = vcmp.eq.f32.partialorder %v1868_v44, 8.507059e+37  ;;  %v1828_v61 = vmul.f32 0.5, %v3015_v31 }
 0x6af   :  { %v1922_v25 = vmul.f32 %v1921_v38, %v3057_v13  ;;  %v1933_v8 = vmul.f32 %v1932_v53, %v3057_v13  ;;  %v1958_v28 = vmul.f32 2.1237322e-06, %v3083_v0  ;;  %v1969_v35 = vmul.f32 3.8918573e-05, %v3083_v0 }
 0x6b0   :  { %v2283_v7 = vpop.eup %2282  ;;  %v1897_v10 = vmul.f32 %v1896_v50, %v3035_v5 }
 0x6b1   :  { %v1860_v12 = vmul.f32 %v2283_v7, %v1858_v6  ;;  %v1934_v14 = vadd.f32 0.112945676, %v1933_v8  ;;  %v1923_v33 = vadd.f32 0.05243302, %v1922_v25  ;;  %v1959_v36 = vadd.f32 0.00028619796, %v1958_v28 }
 0x6b2   :  { %v1970_v39 = vadd.f32 0.001143296, %v1969_v35  ;;  %v1898_v40 = vadd.f32 1.0, %v1897_v10  ;;  %vm1865_vm10 = vweird.f32 %v2283_v7  ;;  %v1886_v6 = vmul.f32 %v1885_v48, %v3035_v5 }
 0x6b3   :  { %v1861_v18 = vsub.f32 1.0, %v1860_v12  ;;  %v1935_v20 = vmul.f32 %v1934_v14, %v3057_v13  ;;  %v1960_v45 = vmul.f32 %v1959_v36, %v3083_v0  ;;  %vm1866_vm12 = vmor %vm1864_vm11, %vm1865_vm10  ;;  %v1924_v24 = vmul.f32 %v1923_v33, %v3057_v13 }
 0x6b4   :  { %v1971_v34 = vmul.f32 %v1970_v39, %v3083_v0  ;;  %2284 = vrcp.f32 %v1898_v40  ;;  %v1887_v3 = vadd.f32 1.1283791, %v1886_v6  ;;  %v1908_v5 = vand.u32 2147483647, %v1898_v40 }
 0x6b5   :  { %v1862_v63 = vmul.f32 %v2283_v7, %v1861_v18  ;;  %v1936_v11 = vadd.f32 0.4994258, %v1935_v20  ;;  %v1961_v26 = vadd.f32 0.0036580483, %v1960_v45  ;;  %v1925_v55 = vadd.f32 0.18741608, %v1924_v24 }
 0x6b6   :  { %v1972_v22 = vadd.f32 0.014752088, %v1971_v34  ;;  %v1910_v14 = vand.u32 2147483648, %v1898_v40  ;;  %v1888_v31 = vmul.f32 %v1887_v3, %v3029_v1  ;;  %vm1904_vm13 = vweird.f32 %v1898_v40 }
 0x6b7   :  { %v1863_v46 = vadd.f32 %v2283_v7, %v1862_v63  ;;  %v1937_v51 = vmul.f32 %v1936_v11, %v3057_v13  ;;  %v1962_v38 = vmul.f32 %v1961_v26, %v3083_v0  ;;  %v1926_v25 = vmul.f32 %v1925_v55, %v3057_v13 }
 0x6b8   :  { %v1973_v49 = vmul.f32 %v1972_v22, %v3083_v0  ;;  %vm1909_vm2 = vcmp.eq.f32.partialorder %v1908_v5, 8.507059e+37  ;;  %v1911_v36 = vor.u32 1.1754944e-38, %v1910_v14  ;;  %v1829_v24 = vmul.f32 0.5, %v3026_v4 }
 0x6b9   :  { %v1867_v43 = vsel %vm1866_vm12, %v2283_v7, %v1863_v46  ;;  %v1938_v54 = vadd.f32 1.0, %v1937_v51  ;;  %v1963_v12 = vadd.f32 0.05243302, %v1962_v38  ;;  %v1927_v18 = vadd.f32 1.1283791, %v1926_v25 }
 0x6ba   :  { %v1872_v30 = vsel %vm1869_vm14, %v1871_v42, %v1867_v43  ;;  %v2285_v58 = vpop.eup %2284  ;;  %v1974_v59 = vadd.f32 0.112945676, %v1973_v49  ;;  %v1830_v55 = vmul.f32 0.5, %v3039_v19  ;;  %v2004_v19 = vperm.slane %v2934_v9, 6 }
 0x6bb   :  { %v1873_v57 = vmul.f32 %v1872_v30, %v1848_v15  ;;  %2286 = vrcp.f32 %v1938_v54  ;;  %v1900_v60 = vmul.f32 %v2285_v58, %v1898_v40  ;;  %vm1905_vm15 = vweird.f32 %v2285_v58 }
 0x6bc   :  { %v1975_v17 = vmul.f32 %v1974_v59, %v3083_v0  ;;  %vm1906_vm1 = vmor %vm1904_vm13, %vm1905_vm15  ;;  %v1950_v13 = vand.u32 2147483648, %v1938_v54  ;;  %v1964_v33 = vmul.f32 %v1963_v12, %v3083_v0  ;;  %v1948_v27 = vand.u32 2147483647, %v1938_v54 }
 0x6bd   :  { %v2188_v16 = vclamps-f32 %v1873_v57, 1.0  ;;  %v1901_v62 = vsub.f32 1.0, %v1900_v60  ;;  %vm1944_vm4 = vweird.f32 %v1938_v54  ;;  %v1928_v45 = vmul.f32 %v1927_v18, %v3047_v37 }
 0x6be   :  { %v1976_v8 = vadd.f32 0.4994258, %v1975_v17  ;;  %v1951_v40 = vor.u32 1.1754944e-38, %v1950_v13  ;;  %v1965_v11 = vadd.f32 0.18741608, %v1964_v33  ;;  %vm1949_vm6 = vcmp.eq.f32.partialorder %v1948_v27, 8.507059e+37 }
 0x6bf   :  { %v1996_v53 = vadd.f32 1.0, %v2188_v16  ;;  %v1902_v50 = vmul.f32 %v2285_v58, %v1901_v62  ;;  %v1831_v17 = vmul.f32 0.5, %v3065_v52 }
 0x6c0   :  { %v1977_v35 = vmul.f32 %v1976_v8, %v3083_v0  ;;  %v1966_v15 = vmul.f32 %v1965_v11, %v3083_v0 }
 0x6c1   :  { %v2000_v7 = vmul.f32 %v1996_v53, %v1828_v61  ;;  %v2287_v21 = vpop.eup %2286  ;;  %v1903_v10 = vadd.f32 %v2285_v58, %v1902_v50 }
 0x6c2   :  { %v1940_v28 = vmul.f32 %v2287_v21, %v1938_v54  ;;  %v1978_v32 = vadd.f32 1.0, %v1977_v35  ;;  %vm1945_vm3 = vweird.f32 %v2287_v21 }
 0x6c3   :  { %2021 = vmatmul.f32.vlgmr.msra.gmra.mxu0 %v2000_v7  ;;  %v1907_v20 = vsel %vm1906_vm1, %v2285_v58, %v1903_v10  ;;  %vm1946_vm5 = vmor %vm1944_vm4, %vm1945_vm3  ;;  %v1967_v58 = vadd.f32 1.1283791, %v1966_v15 }
 0x6c4   :  { %v1941_v23 = vsub.f32 1.0, %v1940_v28  ;;  %2288 = vrcp.f32 %v1978_v32  ;;  %v1912_v63 = vsel %vm1909_vm2, %v1911_v36, %v1907_v20  ;;  %v1990_v49 = vand.u32 2147483648, %v1978_v32 }
 0x6c5   :  { %v1913_v1 = vmul.f32 %v1912_v63, %v1888_v31  ;;  %v1988_v6 = vand.u32 2147483647, %v1978_v32  ;;  %vm1984_vm8 = vweird.f32 %v1978_v32  ;;  %v1968_v0 = vmul.f32 %v1967_v58, %v3076_v56 }
 0x6c6   :  { %v1942_v39 = vmul.f32 %v2287_v21, %v1941_v23  ;;  %v1991_v4 = vor.u32 1.1754944e-38, %v1990_v49 }
 0x6c7   :  { %v2189_v46 = vclamps-f32 %v1913_v1, 1.0  ;;  %vm1989_vm10 = vcmp.eq.f32.partialorder %v1988_v6, 8.507059e+37 }
 0x6c8   :  { %v1943_v44 = vadd.f32 %v2287_v21, %v1942_v39 }
 0x6c9   :  { %v1997_v22 = vadd.f32 1.0, %v2189_v46 }
 0x6ca   :  { %v1947_v34 = vsel %vm1946_vm5, %v2287_v21, %v1943_v44  ;;  %v2289_v48 = vpop.eup %2288 }
 0x6cb   :  { %v1952_v42 = vsel %vm1949_vm6, %v1951_v40, %v1947_v34  ;;  %v1980_v43 = vmul.f32 %v2289_v48, %v1978_v32  ;;  %v2001_v30 = vmul.f32 %v1997_v22, %v1829_v24  ;;  %vm1985_vm7 = vweird.f32 %v2289_v48 }
 0x6cc   :  { %v1953_v51 = vmul.f32 %v1952_v42, %v1928_v45  ;;  %vm1986_vm9 = vmor %vm1984_vm8, %vm1985_vm7 }
 0x6cd   :  { %v1981_v26 = vsub.f32 1.0, %v1980_v43  ;;  %2024 = vmatmul.f32.gmra.mxu0 %v2001_v30 }
 0x6ce   :  { %v2190_v54 = vclamps-f32 %v1953_v51, 1.0 }
 0x6cf   :  { %v1982_v37 = vmul.f32 %v2289_v48, %v1981_v26 }
 0x6d0   :  { %v1998_v57 = vadd.f32 1.0, %v2190_v54 }
 0x6d1   :  { %v1983_v16 = vadd.f32 %v2289_v48, %v1982_v37 }
 0x6d2   :  { %v2002_v59 = vmul.f32 %v1998_v57, %v1830_v55 }
 0x6d3   :  { %v1987_v60 = vsel %vm1986_vm9, %v2289_v48, %v1983_v16 }
 0x6d4   :  { %v1992_v38 = vsel %vm1989_vm10, %v1991_v4, %v1987_v60 }
 0x6d5   :  { %v1993_v61 = vmul.f32 %v1992_v38, %v1968_v0  ;;  %2027 = vmatmul.f32.gmra.mxu0 %v2002_v59 }
 0x6d7   :  { %v2191_v53 = vclamps-f32 %v1993_v61, 1.0 }
 0x6d9   :  { %v1999_v62 = vadd.f32 1.0, %v2191_v53 }
 0x6db   :  { %v2003_v3 = vmul.f32 %v1999_v62, %v1831_v17 }
 0x6dd   :  { %2030 = vmatmul.f32.gmra.mxu0 %v2003_v3 }
 0x740   :  { %v2022_v25 = vpop.f32.mrf.mxu0 }
 0x741   :  { %v2023_v7 = vadd.f32 %v2022_v25, %v2004_v19 }
 0x743   :  { %v2034_v8 = vadd.f32 %v2023_v7, %v2940_v2 }
 0x745   :  { %2038 = vst.msk [vmem:[#allocation2] sm:$0xff] %vm62_vm0, %v2034_v8 }
 0x74a   :  { %v2025_v56 = vpop.f32.mrf.mxu0 }
 0x74b   :  { %v2026_v50 = vadd.f32 %v2025_v56, %v2004_v19 }
 0x74d   :  { %v2035_v5 = vadd.f32 %v2026_v50, %v2947_v29 }
 0x74f   :  { %2039 = vst.msk [vmem:[#allocation2 + $0x8] sm:$0xff] %vm62_vm0, %v2035_v5 }
 0x752   :  { %v2028_v21 = vpop.f32.mrf.mxu0 }
 0x753   :  { %v2029_v12 = vadd.f32 %v2028_v21, %v2004_v19 }
 0x755   :  { %v2036_v52 = vadd.f32 %v2029_v12, %v2954_v41 }
 0x757   :  { %2040 = vst.msk [vmem:[#allocation2 + $0x10] sm:$0xff] %vm62_vm0, %v2036_v52 }
 0x75a   :  { %v2031_v9 = vpop.f32.mrf.mxu0 }
 0x75b   :  { %v2032_v2 = vadd.f32 %v2031_v9, %v2004_v19 }
 0x75d   :  { %v2037_v29 = vadd.f32 %v2032_v2, %v2961_v47 }
 0x75f   :  { %2041 = vst.msk [vmem:[#allocation2 + $0x18] sm:$0xff] %vm62_vm0, %v2037_v29 }
 0x760   :  { %2054 = dma.vmem_to_hbm [thread:$0]  %s2047_s28, 512, %s2049_s2, [#allocation3], %s2324_s6, %s2324_s6, %s2325_s7  }
 0x761   :  { %2319 = dma.done.wait [#allocation3], 512  }
 0x762   :  { %2320 = vsyncadd [#allocation3], 4294966784 }
 0x763   :  { %2059 = vsyncpa [#allocation3], 1 }

</bundles_post_ra>
